<compile_context>
chip_gen: v7x
topology: tpu7x:2x2x1
jax: 0.10.0
libtpu: 0.0.40
codegen_flags: <defaults>
</compile_context>

<pallas_src>
import functools

import numpy as np

import jax
import jax.numpy as jnp
from jax.experimental import pallas as pl
from jax.experimental.pallas import tpu as pltpu


def _bn_relu_conv_kernel(x_ref, g_ref, b_ref, w_ref, m_ref, o_ref,
                         ybuf_ref, z_ref, *, H, W, C, CO, eps, pad):
    # x_ref  : (C, H*W)        f32   input, channels-major (free reshape of NCHW)
    # g_ref  : (C, 1)          f32   batchnorm gamma
    # b_ref  : (C, 1)          f32   batchnorm beta
    # w_ref  : (9*CO, C)       bf16  conv taps, tap-major rows (t = kh*3 + kw)
    # m_ref  : (2, H*W)        f32   constant border masks: [0]=w>=1, [1]=w<=W-2
    # o_ref  : (CO, H*W)       f32   conv output, channels-major (== NCHW flat)
    # ybuf_ref: (C, 3*pad)     bf16  lane-padded BN+ReLU slab (y at [pad, pad+H*W))
    # z_ref  : (9*CO, 3*pad)   f32   all 9 tap images from one matmul
    HW = H * W
    inv_n = 1.0 / HW

    x = x_ref[...]                                             # (C, HW) f32

    # --- BatchNorm2d (training mode: biased batch stats), two-pass form ---
    mean = jnp.sum(x, axis=1, keepdims=True) * inv_n           # (C, 1)
    xc = x - mean
    var = jnp.sum(xc * xc, axis=1, keepdims=True) * inv_n      # (C, 1)
    scale = g_ref[...] * jax.lax.rsqrt(var + eps)

    # --- BN + ReLU, bf16 only for the MXU operands ---
    y = jnp.maximum(xc * scale + b_ref[...], 0.0).astype(jnp.bfloat16)   # (C, HW)

    # --- lane-padded slab: zero only the margins (aligned 128-lane stores),
    #     write the interior once. Margins give free zero-padding for the h
    #     (row) direction of the 3x3 halo. ---
    zeros_tile = jnp.zeros((C, pad), jnp.bfloat16)
    ybuf_ref[:, 0:pad] = zeros_tile                 # left margin  [0, 128)
    ybuf_ref[:, 2 * pad:3 * pad] = zeros_tile       # right margin [256, 384) (partly overwritten)
    ybuf_ref[:, pad:pad + HW] = y                   # interior     [128, 324)

    # --- one wide MXU matmul: (9*CO, C) @ (C, 3*pad) -> (9*CO, 3*pad), f32 acc ---
    z_ref[...] = jnp.dot(w_ref[...], ybuf_ref[...],
                         preferred_element_type=jnp.float32)

    # --- tap accumulation: 9 shifted slices + border masks, all in f32 ---
    m = m_ref[...]                                  # (2, HW)
    mask_l = m[0:1, :]                              # valid when reading from w-1
    mask_r = m[1:2, :]                              # valid when reading from w+1

    acc = jnp.zeros((CO, HW), jnp.float32)
    for kh in range(3):
        for kw in range(3):
            t = kh * 3 + kw
            s = (kh - 1) * W + (kw - 1)             # flat shift of this tap
            zt = z_ref[t * CO:(t + 1) * CO, pad + s:pad + s + HW]   # (CO, HW)
            if kw == 0:
                zt = zt * mask_l
            elif kw == 2:
                zt = zt * mask_r
            acc = acc + zt
    o_ref[...] = acc                                # single lane-dense slab store


def bn_relu_conv2d(x_nchw, gamma, beta, w_oihw, eps=1e-5):
    """Fused BatchNorm2d(train-mode) + ReLU + Conv2d(3x3, pad=1, no bias)."""
    N, C, H, W = x_nchw.shape
    assert N == 1, "kernel is specialized for batch size 1 (as in the module)"
    CO = w_oihw.shape[0]
    HW = H * W
    PAD = 128                                       # lane-tile-aligned halo margin

    # Wrapper glue (no transposes of the activation tensor):
    #  * x NCHW -> (C, H*W): pure reshape, no data movement.
    #  * weights -> tap-major (9*CO, C) bf16: tiny constant repack (pre-packable).
    x_cm = x_nchw.reshape(C, HW).astype(jnp.float32)
    wk = jnp.transpose(w_oihw, (2, 3, 0, 1)).reshape(9 * CO, C).astype(jnp.bfloat16)
    g = gamma.reshape(C, 1).astype(jnp.float32)
    b = beta.reshape(C, 1).astype(jnp.float32)

    # constant 0/1 border-column masks (numpy -> folds to an XLA constant)
    wi = np.arange(HW) % W
    masks = jnp.asarray(np.stack([(wi >= 1), (wi <= W - 2)]).astype(np.float32))  # (2, HW)

    kernel = functools.partial(_bn_relu_conv_kernel,
                               H=H, W=W, C=C, CO=CO, eps=eps, pad=PAD)

    out = pl.pallas_call(
        kernel,
        out_shape=jax.ShapeDtypeStruct((CO, HW), jnp.float32),
        grid=(1,),
        in_specs=[
            pl.BlockSpec((C, HW), lambda i: (0, 0)),
            pl.BlockSpec((C, 1), lambda i: (0, 0)),
            pl.BlockSpec((C, 1), lambda i: (0, 0)),
            pl.BlockSpec((9 * CO, C), lambda i: (0, 0)),
            pl.BlockSpec((2, HW), lambda i: (0, 0)),
        ],
        out_specs=pl.BlockSpec((CO, HW), lambda i: (0, 0)),
        scratch_shapes=[
            pltpu.VMEM((C, 3 * PAD), jnp.bfloat16),       # padded BN+ReLU slab
            pltpu.VMEM((9 * CO, 3 * PAD), jnp.float32),   # fused tap-matmul result
        ],
        compiler_params=pltpu.CompilerParams(
            dimension_semantics=("arbitrary",)),
    )(x_cm, g, b, wk, masks)

    # (CO, H*W) is already NCHW-flat: free reshape, no transpose.
    return out.reshape(1, CO, H, W)


def _reference(x_nchw, gamma, beta, w_oihw, eps=1e-5):
    # pure-JAX reference (training-mode BN + ReLU + conv)
    mean = jnp.mean(x_nchw, axis=(0, 2, 3), keepdims=True)
    var = jnp.mean(jnp.square(x_nchw - mean), axis=(0, 2, 3), keepdims=True)
    xn = (x_nchw - mean) * jax.lax.rsqrt(var + eps)
    xn = xn * gamma.reshape(1, -1, 1, 1) + beta.reshape(1, -1, 1, 1)
    xr = jnp.maximum(xn, 0.0)
    return jax.lax.conv_general_dilated(
        xr, w_oihw, window_strides=(1, 1), padding=((1, 1), (1, 1)),
        dimension_numbers=("NCHW", "OIHW", "NCHW"),
        precision=jax.lax.Precision.HIGHEST)


if __name__ == "__main__":
    key = jax.random.PRNGKey(0)
    k_x, k_w, k_g, k_b = jax.random.split(key, 4)

    N, C, H, W, CO = 1, 128, 14, 14, 32
    x = jax.random.normal(k_x, (N, C, H, W), dtype=jnp.float32)
    w = jax.random.normal(k_w, (CO, C, 3, 3), dtype=jnp.float32) * (2.0 / (C * 9)) ** 0.5
    gamma = jax.random.uniform(k_g, (C,), dtype=jnp.float32, minval=0.5, maxval=1.5)
    beta = jax.random.normal(k_b, (C,), dtype=jnp.float32) * 0.1

    out = jax.jit(bn_relu_conv2d)(x, gamma, beta, w)
    out = jax.block_until_ready(out)
    assert out.shape == (N, CO, H, W), out.shape

    ref = _reference(x, gamma, beta, w)
    # bf16 MXU operands with f32 accumulation -> ~1e-3..1e-2 abs error budget
    assert jnp.allclose(out, ref, rtol=2e-2, atol=2e-2), (
        float(jnp.max(jnp.abs(out - ref))))

    print("KERNEL_OK")
</pallas_src>

<mosaic_0001>
module attributes {stable_mosaic.version = 11 : i64} {
  func.func @_bn_relu_conv_kernel(%arg0: i32, %arg1: memref<128x196xf32, #tpu.memory_space<vmem>>, %arg2: memref<128x1xf32, #tpu.memory_space<vmem>>, %arg3: memref<128x1xf32, #tpu.memory_space<vmem>>, %arg4: memref<288x128xbf16, #tpu.memory_space<vmem>>, %arg5: memref<2x196xf32, #tpu.memory_space<vmem>>, %arg6: memref<32x196xf32, #tpu.memory_space<vmem>>, %arg7: memref<128x384xbf16, #tpu.memory_space<vmem>>, %arg8: memref<288x384xf32, #tpu.memory_space<vmem>>) attributes {dimension_semantics = [#tpu.dimension_semantics<arbitrary>], iteration_bounds = array<i64: 1>, scalar_prefetch = 0 : i64, scratch_operands = 2 : i64, tpu.core_type = #tpu.core_type<tc>, window_params = [{pipeline_mode = #tpu.pipeline_mode<synchronous>, transform_indices = @transform_0, window_bounds = array<i64: 128, 196>}, {pipeline_mode = #tpu.pipeline_mode<synchronous>, transform_indices = @transform_1, window_bounds = array<i64: 128, 1>}, {pipeline_mode = #tpu.pipeline_mode<synchronous>, transform_indices = @transform_2, window_bounds = array<i64: 128, 1>}, {pipeline_mode = #tpu.pipeline_mode<synchronous>, transform_indices = @transform_3, window_bounds = array<i64: 288, 128>}, {pipeline_mode = #tpu.pipeline_mode<synchronous>, transform_indices = @transform_4, window_bounds = array<i64: 2, 196>}, {pipeline_mode = #tpu.pipeline_mode<synchronous>, transform_indices = @transform_5, window_bounds = array<i64: 32, 196>}]} {
    %c0 = arith.constant 0 : index
    %c0_0 = arith.constant 0 : index
    %0 = vector.load %arg1[%c0, %c0_0] : memref<128x196xf32, #tpu.memory_space<vmem>>, vector<128x196xf32>
    %cst = arith.constant dense<0.000000e+00> : vector<128xf32>
    %1 = vector.multi_reduction <add>, %0, %cst [1] : vector<128x196xf32> to vector<128xf32>
    %2 = vector.shape_cast %1 : vector<128xf32> to vector<128x1xf32>
    %cst_1 = arith.constant 0.00510204071 : f32
    %3 = vector.broadcast %cst_1 : f32 to vector<128x1xf32>
    %4 = arith.mulf %2, %3 : vector<128x1xf32>
    %5 = vector.broadcast %4 : vector<128x1xf32> to vector<128x196xf32>
    %6 = arith.subf %0, %5 : vector<128x196xf32>
    %7 = arith.mulf %6, %6 : vector<128x196xf32>
    %cst_2 = arith.constant dense<0.000000e+00> : vector<128xf32>
    %8 = vector.multi_reduction <add>, %7, %cst_2 [1] : vector<128x196xf32> to vector<128xf32>
    %9 = vector.shape_cast %8 : vector<128xf32> to vector<128x1xf32>
    %cst_3 = arith.constant 0.00510204071 : f32
    %10 = vector.broadcast %cst_3 : f32 to vector<128x1xf32>
    %11 = arith.mulf %9, %10 : vector<128x1xf32>
    %c0_4 = arith.constant 0 : index
    %c0_5 = arith.constant 0 : index
    %12 = vector.load %arg2[%c0_4, %c0_5] : memref<128x1xf32, #tpu.memory_space<vmem>>, vector<128x1xf32>
    %cst_6 = arith.constant 9.99999974E-6 : f32
    %13 = vector.broadcast %cst_6 : f32 to vector<128x1xf32>
    %14 = arith.addf %11, %13 : vector<128x1xf32>
    %15 = math.rsqrt %14 : vector<128x1xf32>
    %16 = arith.mulf %12, %15 : vector<128x1xf32>
    %17 = vector.broadcast %16 : vector<128x1xf32> to vector<128x196xf32>
    %18 = arith.mulf %6, %17 : vector<128x196xf32>
    %c0_7 = arith.constant 0 : index
    %c0_8 = arith.constant 0 : index
    %19 = vector.load %arg3[%c0_7, %c0_8] : memref<128x1xf32, #tpu.memory_space<vmem>>, vector<128x1xf32>
    %20 = vector.broadcast %19 : vector<128x1xf32> to vector<128x196xf32>
    %21 = arith.addf %18, %20 : vector<128x196xf32>
    %cst_9 = arith.constant 0.000000e+00 : f32
    %22 = vector.broadcast %cst_9 : f32 to vector<128x196xf32>
    %23 = arith.maximumf %21, %22 : vector<128x196xf32>
    %24 = arith.truncf %23 : vector<128x196xf32> to vector<128x196xbf16>
    %cst_10 = arith.constant 0.000000e+00 : bf16
    %25 = vector.broadcast %cst_10 : bf16 to vector<128x128xbf16>
    %c0_11 = arith.constant 0 : index
    %c0_12 = arith.constant 0 : index
    %26 = vector.load %arg7[%c0_11, %c0_12] : memref<128x384xbf16, #tpu.memory_space<vmem>>, vector<128x128xbf16>
    tpu.vector_store %arg7[%c0_11, %c0_12], %25 {strides = array<i32>} : memref<128x384xbf16, #tpu.memory_space<vmem>>, vector<128x128xbf16>,
    %c0_13 = arith.constant 0 : index
    %c256 = arith.constant 256 : index
    %27 = vector.load %arg7[%c0_13, %c256] : memref<128x384xbf16, #tpu.memory_space<vmem>>, vector<128x128xbf16>
    tpu.vector_store %arg7[%c0_13, %c256], %25 {strides = array<i32>} : memref<128x384xbf16, #tpu.memory_space<vmem>>, vector<128x128xbf16>,
    %c0_14 = arith.constant 0 : index
    %c128 = arith.constant 128 : index
    %28 = vector.load %arg7[%c0_14, %c128] : memref<128x384xbf16, #tpu.memory_space<vmem>>, vector<128x196xbf16>
    tpu.vector_store %arg7[%c0_14, %c128], %24 {strides = array<i32>} : memref<128x384xbf16, #tpu.memory_space<vmem>>, vector<128x196xbf16>,
    %c0_15 = arith.constant 0 : index
    %c0_16 = arith.constant 0 : index
    %29 = vector.load %arg4[%c0_15, %c0_16] : memref<288x128xbf16, #tpu.memory_space<vmem>>, vector<288x128xbf16>
    %c0_17 = arith.constant 0 : index
    %c0_18 = arith.constant 0 : index
    %30 = vector.load %arg7[%c0_17, %c0_18] : memref<128x384xbf16, #tpu.memory_space<vmem>>, vector<128x384xbf16>
    %cst_19 = arith.constant dense<0.000000e+00> : vector<288x384xf32>
    %31 = tpu.matmul %29, %30, %cst_19 {dimension_numbers = #tpu.dot_dimension_numbers<[1], [0], [0], [1], [0, 0, 1, 1], [], []>} : vector<288x128xbf16>, vector<128x384xbf16>, vector<288x384xf32> -> vector<288x384xf32>
    %c0_20 = arith.constant 0 : index
    %c0_21 = arith.constant 0 : index
    %32 = vector.load %arg8[%c0_20, %c0_21] : memref<288x384xf32, #tpu.memory_space<vmem>>, vector<288x384xf32>
    tpu.vector_store %arg8[%c0_20, %c0_21], %31 {strides = array<i32>} : memref<288x384xf32, #tpu.memory_space<vmem>>, vector<288x384xf32>,
    %c0_22 = arith.constant 0 : index
    %c0_23 = arith.constant 0 : index
    %33 = vector.load %arg5[%c0_22, %c0_23] : memref<2x196xf32, #tpu.memory_space<vmem>>, vector<2x196xf32>
    %34 = vector.extract_strided_slice %33 {offsets = [0, 0], sizes = [1, 196], strides = [1, 1]} : vector<2x196xf32> to vector<1x196xf32>
    %35 = vector.extract_strided_slice %33 {offsets = [1, 0], sizes = [1, 196], strides = [1, 1]} : vector<2x196xf32> to vector<1x196xf32>
    %cst_24 = arith.constant 0.000000e+00 : f32
    %36 = vector.broadcast %cst_24 : f32 to vector<32x196xf32>
    %c0_25 = arith.constant 0 : index
    %c113 = arith.constant 113 : index
    %37 = vector.load %arg8[%c0_25, %c113] : memref<288x384xf32, #tpu.memory_space<vmem>>, vector<32x196xf32>
    %38 = vector.broadcast %34 : vector<1x196xf32> to vector<32x196xf32>
    %39 = arith.mulf %37, %38 : vector<32x196xf32>
    %40 = arith.addf %36, %39 : vector<32x196xf32>
    %c32 = arith.constant 32 : index
    %c114 = arith.constant 114 : index
    %41 = vector.load %arg8[%c32, %c114] : memref<288x384xf32, #tpu.memory_space<vmem>>, vector<32x196xf32>
    %42 = arith.addf %40, %41 : vector<32x196xf32>
    %c64 = arith.constant 64 : index
    %c115 = arith.constant 115 : index
    %43 = vector.load %arg8[%c64, %c115] : memref<288x384xf32, #tpu.memory_space<vmem>>, vector<32x196xf32>
    %44 = vector.broadcast %35 : vector<1x196xf32> to vector<32x196xf32>
    %45 = arith.mulf %43, %44 : vector<32x196xf32>
    %46 = arith.addf %42, %45 : vector<32x196xf32>
    %c96 = arith.constant 96 : index
    %c127 = arith.constant 127 : index
    %47 = vector.load %arg8[%c96, %c127] : memref<288x384xf32, #tpu.memory_space<vmem>>, vector<32x196xf32>
    %48 = vector.broadcast %34 : vector<1x196xf32> to vector<32x196xf32>
    %49 = arith.mulf %47, %48 : vector<32x196xf32>
    %50 = arith.addf %46, %49 : vector<32x196xf32>
    %c128_26 = arith.constant 128 : index
    %c128_27 = arith.constant 128 : index
    %51 = vector.load %arg8[%c128_26, %c128_27] : memref<288x384xf32, #tpu.memory_space<vmem>>, vector<32x196xf32>
    %52 = arith.addf %50, %51 : vector<32x196xf32>
    %c160 = arith.constant 160 : index
    %c129 = arith.constant 129 : index
    %53 = vector.load %arg8[%c160, %c129] : memref<288x384xf32, #tpu.memory_space<vmem>>, vector<32x196xf32>
    %54 = vector.broadcast %35 : vector<1x196xf32> to vector<32x196xf32>
    %55 = arith.mulf %53, %54 : vector<32x196xf32>
    %56 = arith.addf %52, %55 : vector<32x196xf32>
    %c192 = arith.constant 192 : index
    %c141 = arith.constant 141 : index
    %57 = vector.load %arg8[%c192, %c141] : memref<288x384xf32, #tpu.memory_space<vmem>>, vector<32x196xf32>
    %58 = vector.broadcast %34 : vector<1x196xf32> to vector<32x196xf32>
    %59 = arith.mulf %57, %58 : vector<32x196xf32>
    %60 = arith.addf %56, %59 : vector<32x196xf32>
    %c224 = arith.constant 224 : index
    %c142 = arith.constant 142 : index
    %61 = vector.load %arg8[%c224, %c142] : memref<288x384xf32, #tpu.memory_space<vmem>>, vector<32x196xf32>
    %62 = arith.addf %60, %61 : vector<32x196xf32>
    %c256_28 = arith.constant 256 : index
    %c143 = arith.constant 143 : index
    %63 = vector.load %arg8[%c256_28, %c143] : memref<288x384xf32, #tpu.memory_space<vmem>>, vector<32x196xf32>
    %64 = vector.broadcast %35 : vector<1x196xf32> to vector<32x196xf32>
    %65 = arith.mulf %63, %64 : vector<32x196xf32>
    %66 = arith.addf %62, %65 : vector<32x196xf32>
    %c0_29 = arith.constant 0 : index
    %c0_30 = arith.constant 0 : index
    %67 = vector.load %arg6[%c0_29, %c0_30] : memref<32x196xf32, #tpu.memory_space<vmem>>, vector<32x196xf32>
    tpu.vector_store %arg6[%c0_29, %c0_30], %66 {strides = array<i32>} : memref<32x196xf32, #tpu.memory_space<vmem>>, vector<32x196xf32>,
    return
  }
  func.func @transform_0(%arg0: i32) -> (i32, i32) {
    %c0_i32 = arith.constant 0 : i32
    %c0_i32_0 = arith.constant 0 : i32
    %c0_i32_1 = arith.constant 0 : i32
    return %c0_i32, %c0_i32_0 : i32, i32
  }
  func.func @transform_1(%arg0: i32) -> (i32, i32) {
    %c0_i32 = arith.constant 0 : i32
    %c0_i32_0 = arith.constant 0 : i32
    %c0_i32_1 = arith.constant 0 : i32
    return %c0_i32, %c0_i32_0 : i32, i32
  }
  func.func @transform_2(%arg0: i32) -> (i32, i32) {
    %c0_i32 = arith.constant 0 : i32
    %c0_i32_0 = arith.constant 0 : i32
    %c0_i32_1 = arith.constant 0 : i32
    return %c0_i32, %c0_i32_0 : i32, i32
  }
  func.func @transform_3(%arg0: i32) -> (i32, i32) {
    %c0_i32 = arith.constant 0 : i32
    %c0_i32_0 = arith.constant 0 : i32
    %c0_i32_1 = arith.constant 0 : i32
    return %c0_i32, %c0_i32_0 : i32, i32
  }
  func.func @transform_4(%arg0: i32) -> (i32, i32) {
    %c0_i32 = arith.constant 0 : i32
    %c0_i32_0 = arith.constant 0 : i32
    %c0_i32_1 = arith.constant 0 : i32
    return %c0_i32, %c0_i32_0 : i32, i32
  }
  func.func @transform_5(%arg0: i32) -> (i32, i32) {
    %c0_i32 = arith.constant 0 : i32
    %c0_i32_0 = arith.constant 0 : i32
    %c0_i32_1 = arith.constant 0 : i32
    return %c0_i32, %c0_i32_0 : i32, i32
  }
}

</mosaic_0001>

<bundles_post_ra>
// kernel: bn_relu_conv2d.1
= control target key start
LH: loop header
LB: loop body
LE: loop exit
PB: predicated region body
PF: predicated region fallthrough
CT: control target
= control target key end

     0   :  { %vm53_vm0 = vcmask 556032   ;;  %s2294_s18 = smov 113   ;;  %s2295_s19 = smov 115   ;;  %vm1512_vm1 = vcmask 941056   ;;  %vm1443_vm2 = vcmask 1039360   ;;  %vm1771_vm3 = vcmask 7168   ;;  %s3480_s0 = inlined_call_operand.vmem [shape: f32[128,196], index: 0, kind: input, shape index: {}]   ;;  %s3481_s2 = inlined_call_operand.vmem [shape: f32[128,1], index: 2, kind: input, shape index: {}]   ;;  %s3482_s1 = inlined_call_operand.vmem [shape: f32[128,1], index: 1, kind: input, shape index: {}]   ;;  %s3483_s3 = inlined_call_operand.vmem [shape: bf16[288,128], index: 3, kind: input, shape index: {}]   ;;  %s3484_s4 = inlined_call_operand.vmem [shape: f32[2,196], index: 4, kind: input, shape index: {}]   ;;  %s3485_s5 = inlined_call_operand.vmem [shape: f32[32,196], index: 5, kind: output, shape index: {}]  }
   0x1   :  { %v2339_v0 = vld [vmem:[%s3480_s0] sm:$0xff]  ;;  %v2344_v1 = vld [vmem:[%s3480_s0 + $0x8] sm:$0xff]  ;;  %v2361_v5 = vld [vmem:[%s3480_s0 + $0x10] sm:$0xff]  ;;  %s2296_s20 = smov 127   ;;  %s2298_s21 = smov 13   ;;  %vm1848_vm4 = vcmask 105472  }
   0x2   :  { %v2349_v2 = vld [vmem:[%s3480_s0 + $0x20] sm:$0xff]  ;;  %v54_v3 = vsel %vm53_vm0, %v2344_v1, 0.0  ;;  %v2356_v4 = vld [vmem:[%s3480_s0 + $0x28] sm:$0xff]  ;;  %v2366_v6 = vld [vmem:[%s3480_s0 + $0x18] sm:$0xff]  ;;  %s2299_s22 = smov 15   ;;  %s2301_s7 = smov 98  }
   0x3   :  { %v55_v7 = vadd.f32 %v54_v3, %v2339_v0  ;;  %v62_v8 = vsel %vm53_vm0, %v2356_v4, 0.0  ;;  %v58_v9 = vsel %vm53_vm0, %v2366_v6, 0.0  ;;  %v2376_v10 = vld [vmem:[%s3480_s0 + $0x30] sm:$0xff]  ;;  %v2381_v11 = vld [vmem:[%s3480_s0 + $0x38] sm:$0xff]  ;;  %v2395_v16 = vld [vmem:[%s3480_s0 + $0x48] sm:$0xff]  ;;  %v2293_v3 = vmov 0  }
   0x4   :  { %v63_v12 = vadd.f32 %v62_v8, %v2349_v2  ;;  %v66_v13 = vsel %vm53_vm0, %v2381_v11, 0.0  ;;  %v2389_v14 = vld [vmem:[%s3480_s0 + $0x58] sm:$0xff]  ;;  %v59_v15 = vadd.f32 %v58_v9, %v2361_v5  ;;  %v2401_v18 = vld [vmem:[%s3480_s0 + $0x40] sm:$0xff]  ;;  %v70_v19 = vsel %vm53_vm0, %v2395_v16, 0.0  ;;  %v2408_v20 = vld [vmem:[%s3480_s0 + $0x50] sm:$0xff]  ;;  %2240 = vset.pattern.permute.xlu1 %v2293_v3  ;;  %630 = vst [vmem:[#allocation2] sm:$0xff] %v2293_v3  ;;  %2241 = vset.pattern.permute.xlu0 %v2293_v3 }
   0x5   :  { %56 = vadd.xlane.f32.xlu0 %v55_v7  ;;  %v67_v17 = vadd.f32 %v66_v13, %v2376_v10  ;;  %v74_v21 = vsel %vm53_vm0, %v2389_v14, 0.0  ;;  %v2415_v22 = vld [vmem:[%s3480_s0 + $0x68] sm:$0xff]  ;;  %v2420_v23 = vld [vmem:[%s3480_s0 + $0x78] sm:$0xff]  ;;  %v71_v24 = vadd.f32 %v70_v19, %v2401_v18  ;;  %v2427_v26 = vld [vmem:[%s3480_s0 + $0x60] sm:$0xff]  ;;  %638 = vst [vmem:[#allocation2 + $0x10] sm:$0xff] %v2293_v3  ;;  %862 = vmatprep.mubr.bf16.mxu0 %v2293_v3  ;;  %s2302_s8 = smov 126  }
   0x6   :  { %64 = vadd.xlane.f32.xlu1 %v63_v12  ;;  %v75_v25 = vadd.f32 %v74_v21, %v2408_v20  ;;  %v78_v27 = vsel %vm53_vm0, %v2415_v22, 0.0  ;;  %v2434_v28 = vld [vmem:[%s3480_s0 + $0x70] sm:$0xff]  ;;  %v82_v29 = vsel %vm53_vm0, %v2420_v23, 0.0  ;;  %v2441_v30 = vld [vmem:[%s3480_s0 + $0x88] sm:$0xff]  ;;  %v2446_v31 = vld [vmem:[%s3480_s0 + $0x98] sm:$0xff]  ;;  %639 = vst [vmem:[#allocation2 + $0x28] sm:$0xff] %v2293_v3  ;;  %1002 = vmatprep.mubr.bf16.mxu1 %v2293_v3 }
   0x7   :  { %v79_v32 = vadd.f32 %v78_v27, %v2427_v26  ;;  %v83_v33 = vadd.f32 %v82_v29, %v2434_v28  ;;  %v2453_v34 = vld [vmem:[%s3480_s0 + $0x80] sm:$0xff]  ;;  %v86_v35 = vsel %vm53_vm0, %v2441_v30, 0.0  ;;  %v2460_v36 = vld [vmem:[%s3480_s0 + $0x90] sm:$0xff]  ;;  %v90_v37 = vsel %vm53_vm0, %v2446_v31, 0.0  ;;  %v2467_v38 = vld [vmem:[%s3480_s0 + $0xa8] sm:$0xff]  ;;  %640 = vst [vmem:[#allocation2 + $0x40] sm:$0xff] %v2293_v3 }
   0x8   :  { %v2472_v39 = vld [vmem:[%s3480_s0 + $0xb8] sm:$0xff]  ;;  %v87_v40 = vadd.f32 %v86_v35, %v2453_v34  ;;  %v91_v41 = vadd.f32 %v90_v37, %v2460_v36  ;;  %v2479_v42 = vld [vmem:[%s3480_s0 + $0xa0] sm:$0xff]  ;;  %v94_v43 = vsel %vm53_vm0, %v2467_v38, 0.0  ;;  %v2486_v44 = vld [vmem:[%s3480_s0 + $0xb0] sm:$0xff]  ;;  %641 = vst [vmem:[#allocation2 + $0x58] sm:$0xff] %v2293_v3  ;;  %s2303_s9 = smov 114  }
   0x9   :  { %60 = vadd.xlane.f32.xlu0 %v59_v15  ;;  %v98_v45 = vsel %vm53_vm0, %v2472_v39, 0.0  ;;  %v2493_v46 = vld [vmem:[%s3480_s0 + $0xc8] sm:$0xff]  ;;  %v2498_v47 = vld [vmem:[%s3480_s0 + $0xd8] sm:$0xff]  ;;  %v95_v48 = vadd.f32 %v94_v43, %v2479_v42  ;;  %v2505_v50 = vld [vmem:[%s3480_s0 + $0xc0] sm:$0xff]  ;;  %642 = vst [vmem:[#allocation2 + $0x70] sm:$0xff] %v2293_v3  ;;  %vm1986_vm5 = vcmask 121856  }
   0xa   :  { %68 = vadd.xlane.f32.xlu1 %v67_v17  ;;  %v99_v49 = vadd.f32 %v98_v45, %v2486_v44  ;;  %v102_v51 = vsel %vm53_vm0, %v2493_v46, 0.0  ;;  %v2512_v52 = vld [vmem:[%s3480_s0 + $0xd0] sm:$0xff]  ;;  %v106_v53 = vsel %vm53_vm0, %v2498_v47, 0.0  ;;  %v2519_v54 = vld [vmem:[%s3480_s0 + $0xe8] sm:$0xff]  ;;  %v2524_v55 = vld [vmem:[%s3480_s0 + $0xf8] sm:$0xff]  ;;  %643 = vst [vmem:[#allocation2 + $0x88] sm:$0xff] %v2293_v3 }
   0xb   :  { %v103_v56 = vadd.f32 %v102_v51, %v2505_v50  ;;  %v107_v57 = vadd.f32 %v106_v53, %v2512_v52  ;;  %v2531_v58 = vld [vmem:[%s3480_s0 + $0xe0] sm:$0xff]  ;;  %v110_v59 = vsel %vm53_vm0, %v2519_v54, 0.0  ;;  %v2538_v60 = vld [vmem:[%s3480_s0 + $0xf0] sm:$0xff]  ;;  %v114_v61 = vsel %vm53_vm0, %v2524_v55, 0.0  ;;  %644 = vst [vmem:[#allocation2 + $0xa0] sm:$0xff] %v2293_v3  ;;  %645 = vst [vmem:[#allocation2 + $0xb8] sm:$0xff] %v2293_v3 }
   0xc   :  { %v111_v62 = vadd.f32 %v110_v59, %v2531_v58  ;;  %v115_v63 = vadd.f32 %v114_v61, %v2538_v60  ;;  %vm1366_vm6 = vcmask 924672   ;;  %vm1565_vm7 = vcmask 1031168  }
   0xd   :  { %72 = vadd.xlane.f32.xlu0 %v71_v24  ;;  %vm1666_vm8 = vcmask 932864   ;;  %vm1807_vm9 = vcmask 916480   ;;  %vm1884_vm10 = vcmask 818176   ;;  %vm1945_vm11 = vcmask 809984  }
   0xe   :  { %76 = vadd.xlane.f32.xlu1 %v75_v25  ;;  %vm2022_vm12 = vcmask 801792  }
  0x11   :  { %80 = vadd.xlane.f32.xlu0 %v79_v32 }
  0x12   :  { %84 = vadd.xlane.f32.xlu1 %v83_v33 }
  0x15   :  { %88 = vadd.xlane.f32.xlu0 %v87_v40 }
  0x16   :  { %92 = vadd.xlane.f32.xlu1 %v91_v41 }
  0x19   :  { %96 = vadd.xlane.f32.xlu0 %v95_v48 }
  0x1a   :  { %100 = vadd.xlane.f32.xlu1 %v99_v49 }
  0x1d   :  { %104 = vadd.xlane.f32.xlu0 %v103_v56 }
  0x1e   :  { %108 = vadd.xlane.f32.xlu1 %v107_v57 }
  0x21   :  { %112 = vadd.xlane.f32.xlu0 %v111_v62 }
  0x22   :  { %116 = vadd.xlane.f32.xlu1 %v115_v63 }
  0x92   :  { %v57_v7 = vpop.xlane.xlu0 %56 }
  0x93   :  { %v118_v8 = vmul.f32 0.0051020407, %v57_v7  ;;  %v65_v9 = vpop.xlane.xlu1 %64 }
  0x94   :  { %v120_v12 = vmul.f32 0.0051020407, %v65_v9 }
  0x95   :  { %v2558_v13 = vsub.f32 %v2339_v0, %v118_v8  ;;  %v2561_v15 = vsub.f32 %v2344_v1, %v118_v8 }
  0x96   :  { %v2564_v17 = vsub.f32 %v2349_v2, %v120_v12  ;;  %v2567_v19 = vsub.f32 %v2356_v4, %v120_v12  ;;  %v61_v21 = vpop.xlane.xlu0 %60 }
  0x97   :  { %v119_v24 = vmul.f32 0.0051020407, %v61_v21  ;;  %v69_v25 = vpop.xlane.xlu1 %68  ;;  %v166_v27 = vmul.f32 %v2558_v13, %v2558_v13  ;;  %v167_v29 = vmul.f32 %v2561_v15, %v2561_v15 }
  0x98   :  { %v121_v0 = vmul.f32 0.0051020407, %v69_v25  ;;  %v170_v1 = vmul.f32 %v2564_v17, %v2564_v17  ;;  %v171_v2 = vmul.f32 %v2567_v19, %v2567_v19 }
  0x99   :  { %v2578_v32 = vsub.f32 %v2361_v5, %v119_v24  ;;  %v2581_v4 = vsub.f32 %v2366_v6, %v119_v24  ;;  %v198_v33 = vsel %vm53_vm0, %v167_v29, 0.0 }
  0x9a   :  { %v2585_v35 = vsub.f32 %v2376_v10, %v121_v0  ;;  %v2588_v37 = vsub.f32 %v2381_v11, %v121_v0  ;;  %v199_v40 = vadd.f32 %v198_v33, %v166_v27  ;;  %v206_v41 = vsel %vm53_vm0, %v171_v2, 0.0  ;;  %v73_v43 = vpop.xlane.xlu0 %72 }
  0x9b   :  { %v77_v45 = vpop.xlane.xlu1 %76  ;;  %v168_v5 = vmul.f32 %v2578_v32, %v2578_v32  ;;  %v169_v6 = vmul.f32 %v2581_v4, %v2581_v4  ;;  %v122_v48 = vmul.f32 0.0051020407, %v73_v43  ;;  %v207_v51 = vadd.f32 %v206_v41, %v170_v1 }
  0x9c   :  { %200 = vadd.xlane.f32.xlu0 %v199_v40  ;;  %v123_v49 = vmul.f32 0.0051020407, %v77_v45  ;;  %v172_v10 = vmul.f32 %v2585_v35, %v2585_v35  ;;  %v173_v11 = vmul.f32 %v2588_v37, %v2588_v37 }
  0x9d   :  { %v202_v53 = vsel %vm53_vm0, %v169_v6, 0.0  ;;  %v2601_v56 = vsub.f32 %v2401_v18, %v122_v48  ;;  %v2604_v57 = vsub.f32 %v2395_v16, %v122_v48 }
  0x9e   :  { %v2607_v59 = vsub.f32 %v2408_v20, %v123_v49  ;;  %v2610_v61 = vsub.f32 %v2389_v14, %v123_v49  ;;  %v203_v62 = vadd.f32 %v202_v53, %v168_v5  ;;  %v210_v63 = vsel %vm53_vm0, %v173_v11, 0.0  ;;  %v81_v7 = vpop.xlane.xlu0 %80 }
  0x9f   :  { %v85_v8 = vpop.xlane.xlu1 %84  ;;  %v124_v9 = vmul.f32 0.0051020407, %v81_v7  ;;  %v174_v12 = vmul.f32 %v2601_v56, %v2601_v56  ;;  %v175_v18 = vmul.f32 %v2604_v57, %v2604_v57  ;;  %v211_v20 = vadd.f32 %v210_v63, %v172_v10 }
  0xa0   :  { %208 = vadd.xlane.f32.xlu0 %v207_v51  ;;  %204 = vadd.xlane.f32.xlu1 %v203_v62  ;;  %v125_v16 = vmul.f32 0.0051020407, %v85_v8  ;;  %v176_v14 = vmul.f32 %v2607_v59, %v2607_v59  ;;  %v177_v21 = vmul.f32 %v2610_v61, %v2610_v61 }
  0xa1   :  { %v2622_v24 = vsub.f32 %v2427_v26, %v124_v9  ;;  %v2625_v25 = vsub.f32 %v2415_v22, %v124_v9  ;;  %v214_v27 = vsel %vm53_vm0, %v175_v18, 0.0 }
  0xa2   :  { %v2629_v29 = vsub.f32 %v2434_v28, %v125_v16  ;;  %v2632_v0 = vsub.f32 %v2420_v23, %v125_v16  ;;  %v218_v1 = vsel %vm53_vm0, %v177_v21, 0.0  ;;  %v89_v2 = vpop.xlane.xlu0 %88  ;;  %v215_v33 = vadd.f32 %v214_v27, %v174_v12 }
  0xa3   :  { %v93_v40 = vpop.xlane.xlu1 %92  ;;  %v126_v41 = vmul.f32 0.0051020407, %v89_v2  ;;  %v178_v26 = vmul.f32 %v2622_v24, %v2622_v24  ;;  %v179_v22 = vmul.f32 %v2625_v25, %v2625_v25  ;;  %v219_v45 = vadd.f32 %v218_v1, %v176_v14 }
  0xa4   :  { %212 = vadd.xlane.f32.xlu1 %v211_v20  ;;  %v127_v43 = vmul.f32 0.0051020407, %v93_v40  ;;  %v180_v28 = vmul.f32 %v2629_v29, %v2629_v29  ;;  %v181_v23 = vmul.f32 %v2632_v0, %v2632_v0  ;;  %216 = vadd.xlane.f32.xlu0 %v215_v33 }
  0xa5   :  { %v2644_v5 = vsub.f32 %v2453_v34, %v126_v41  ;;  %v2647_v6 = vsub.f32 %v2441_v30, %v126_v41  ;;  %v222_v48 = vsel %vm53_vm0, %v179_v22, 0.0 }
  0xa6   :  { %v2651_v49 = vsub.f32 %v2460_v36, %v127_v43  ;;  %v2654_v51 = vsub.f32 %v2446_v31, %v127_v43  ;;  %v226_v10 = vsel %vm53_vm0, %v181_v23, 0.0  ;;  %v97_v11 = vpop.xlane.xlu0 %96  ;;  %v223_v53 = vadd.f32 %v222_v48, %v178_v26 }
  0xa7   :  { %v101_v62 = vpop.xlane.xlu1 %100  ;;  %v128_v63 = vmul.f32 0.0051020407, %v97_v11  ;;  %v182_v34 = vmul.f32 %v2644_v5, %v2644_v5  ;;  %v183_v30 = vmul.f32 %v2647_v6, %v2647_v6  ;;  %v227_v8 = vadd.f32 %v226_v10, %v180_v28 }
  0xa8   :  { %220 = vadd.xlane.f32.xlu1 %v219_v45  ;;  %v129_v7 = vmul.f32 0.0051020407, %v101_v62  ;;  %v184_v36 = vmul.f32 %v2651_v49, %v2651_v49  ;;  %v185_v31 = vmul.f32 %v2654_v51, %v2654_v51  ;;  %224 = vadd.xlane.f32.xlu0 %v223_v53 }
  0xa9   :  { %v2666_v9 = vsub.f32 %v2479_v42, %v128_v63  ;;  %v2669_v12 = vsub.f32 %v2467_v38, %v128_v63  ;;  %v230_v18 = vsel %vm53_vm0, %v183_v30, 0.0 }
  0xaa   :  { %v2673_v16 = vsub.f32 %v2486_v44, %v129_v7  ;;  %v2676_v20 = vsub.f32 %v2472_v39, %v129_v7  ;;  %v234_v14 = vsel %vm53_vm0, %v185_v31, 0.0  ;;  %v105_v21 = vpop.xlane.xlu0 %104  ;;  %v231_v27 = vadd.f32 %v230_v18, %v182_v34  ;;  %v455_v18 = vld [vmem:[%s3481_s2 + $0x8] sm:$0xff] }
  0xab   :  { %v109_v1 = vpop.xlane.xlu1 %108  ;;  %v130_v2 = vmul.f32 0.0051020407, %v105_v21  ;;  %v186_v42 = vmul.f32 %v2666_v9, %v2666_v9  ;;  %v187_v38 = vmul.f32 %v2669_v12, %v2669_v12  ;;  %v235_v40 = vadd.f32 %v234_v14, %v184_v36  ;;  %v459_v14 = vld [vmem:[%s3481_s2 + $0x28] sm:$0xff]  ;;  %v456_v21 = vld [vmem:[%s3481_s2 + $0x10] sm:$0xff] }
  0xac   :  { %228 = vadd.xlane.f32.xlu1 %v227_v8  ;;  %v131_v33 = vmul.f32 0.0051020407, %v109_v1  ;;  %v188_v44 = vmul.f32 %v2673_v16, %v2673_v16  ;;  %v189_v39 = vmul.f32 %v2676_v20, %v2676_v20  ;;  %232 = vadd.xlane.f32.xlu0 %v231_v27  ;;  %v461_v27 = vld [vmem:[%s3481_s2 + $0x38] sm:$0xff] }
  0xad   :  { %v2688_v41 = vsub.f32 %v2505_v50, %v130_v2  ;;  %v2691_v26 = vsub.f32 %v2493_v46, %v130_v2  ;;  %v238_v22 = vsel %vm53_vm0, %v187_v38, 0.0  ;;  %v457_v1 = vld [vmem:[%s3481_s2 + $0x18] sm:$0xff]  ;;  %v463_v2 = vld [vmem:[%s3481_s2 + $0x48] sm:$0xff] }
  0xae   :  { %v2695_v43 = vsub.f32 %v2512_v52, %v131_v33  ;;  %v2698_v45 = vsub.f32 %v2498_v47, %v131_v33  ;;  %v242_v28 = vsel %vm53_vm0, %v189_v39, 0.0  ;;  %v113_v23 = vpop.xlane.xlu0 %112  ;;  %v239_v48 = vadd.f32 %v238_v22, %v186_v42  ;;  %v465_v42 = vld [vmem:[%s3481_s2 + $0x58] sm:$0xff] }
  0xaf   :  { %v132_v10 = vmul.f32 0.0051020407, %v113_v23  ;;  %v190_v50 = vmul.f32 %v2688_v41, %v2688_v41  ;;  %v191_v46 = vmul.f32 %v2691_v26, %v2691_v26  ;;  %v243_v11 = vadd.f32 %v242_v28, %v188_v44  ;;  %v117_v38 = vpop.xlane.xlu1 %116 }
  0xb0   :  { %236 = vadd.xlane.f32.xlu1 %v235_v40  ;;  %v192_v52 = vmul.f32 %v2695_v43, %v2695_v43  ;;  %v193_v47 = vmul.f32 %v2698_v45, %v2698_v45  ;;  %240 = vadd.xlane.f32.xlu0 %v239_v48  ;;  %v133_v33 = vmul.f32 0.0051020407, %v117_v38  ;;  %v458_v48 = vld [vmem:[%s3481_s2 + $0x20] sm:$0xff] }
  0xb1   :  { %v2710_v53 = vsub.f32 %v2531_v58, %v132_v10  ;;  %v2713_v62 = vsub.f32 %v2519_v54, %v132_v10  ;;  %v246_v63 = vsel %vm53_vm0, %v191_v46, 0.0  ;;  %v454_v54 = vld [vmem:[%s3481_s2] sm:$0xff]  ;;  %v464_v10 = vld [vmem:[%s3481_s2 + $0x50] sm:$0xff] }
  0xb2   :  { %v250_v34 = vsel %vm53_vm0, %v193_v47, 0.0  ;;  %v247_v30 = vadd.f32 %v246_v63, %v190_v50  ;;  %v2747_v40 = vsub.f32 %v2524_v55, %v133_v33  ;;  %v2750_v44 = vsub.f32 %v2538_v60, %v133_v33  ;;  %v460_v55 = vld [vmem:[%s3481_s2 + $0x30] sm:$0xff]  ;;  %v462_v60 = vld [vmem:[%s3481_s2 + $0x40] sm:$0xff] }
  0xb3   :  { %v194_v7 = vmul.f32 %v2710_v53, %v2710_v53  ;;  %v195_v8 = vmul.f32 %v2713_v62, %v2713_v62  ;;  %v251_v36 = vadd.f32 %v250_v34, %v192_v52  ;;  %v466_v50 = vld [vmem:[%s3481_s2 + $0x60] sm:$0xff] }
  0xb4   :  { %244 = vadd.xlane.f32.xlu1 %v243_v11  ;;  %248 = vadd.xlane.f32.xlu0 %v247_v30  ;;  %v197_v39 = vmul.f32 %v2747_v40, %v2747_v40  ;;  %v196_v22 = vmul.f32 %v2750_v44, %v2750_v44 }
  0xb5   :  { %v254_v58 = vsel %vm53_vm0, %v195_v8, 0.0 }
  0xb6   :  { %v255_v31 = vadd.f32 %v254_v58, %v194_v7  ;;  %v258_v28 = vsel %vm53_vm0, %v197_v39, 0.0 }
  0xb7   :  { %v259_v23 = vadd.f32 %v258_v28, %v196_v22 }
  0xb8   :  { %252 = vadd.xlane.f32.xlu1 %v251_v36  ;;  %256 = vadd.xlane.f32.xlu0 %v255_v31 }
  0xc9   :  { %472 = vperm.xlu1 %2240, %v454_v54  }
  0xcd   :  { %477 = vperm.xlu1 %2240, %v455_v18  }
  0xce   :  { %497 = vperm.xlu0 %2241, %v459_v14  }
  0xd1   :  { %482 = vperm.xlu1 %2240, %v456_v21  }
  0xd2   :  { %507 = vperm.xlu0 %2241, %v461_v27  }
  0xd5   :  { %487 = vperm.xlu1 %2240, %v457_v1  }
  0xd6   :  { %517 = vperm.xlu0 %2241, %v463_v2   ;;  %v278_v2 = vld [vmem:[%s3482_s1] sm:$0xff] }
  0xda   :  { %527 = vperm.xlu0 %2241, %v465_v42  }
  0xf9   :  { %260 = vadd.xlane.f32.xlu1 %v259_v23 }
 0x10a   :  { %492 = vperm.xlu1 %2240, %v458_v48  }
 0x10e   :  { %502 = vperm.xlu1 %2240, %v460_v55   ;;  %v279_v55 = vld [vmem:[%s3482_s1 + $0x8] sm:$0xff] }
 0x112   :  { %512 = vperm.xlu1 %2240, %v462_v60  }
 0x116   :  { %522 = vperm.xlu1 %2240, %v464_v10  }
 0x11a   :  { %532 = vperm.xlu1 %2240, %v466_v50  }
 0x129   :  { %v201_v46 = vpop.xlane.xlu0 %200 }
 0x12a   :  { %v262_v11 = vmul.f32 0.0051020407, %v201_v46  ;;  %v467_v46 = vld [vmem:[%s3481_s2 + $0x68] sm:$0xff] }
 0x12c   :  { %v294_v52 = vadd.f32 1e-05, %v262_v11 }
 0x12d   :  { %v205_v47 = vpop.xlane.xlu1 %204  ;;  %v209_v63 = vpop.xlane.xlu0 %208 }
 0x12e   :  { %2260 = vrsqrt.f32 %v294_v52  ;;  %v263_v34 = vmul.f32 0.0051020407, %v205_v47  ;;  %v264_v30 = vmul.f32 0.0051020407, %v209_v63 }
 0x130   :  { %v295_v7 = vadd.f32 1e-05, %v263_v34  ;;  %v296_v8 = vadd.f32 1e-05, %v264_v30 }
 0x131   :  { %v213_v36 = vpop.xlane.xlu1 %212  ;;  %v217_v58 = vpop.xlane.xlu0 %216 }
 0x132   :  { %2262 = vrsqrt.f32 %v295_v7  ;;  %v265_v31 = vmul.f32 0.0051020407, %v213_v36  ;;  %v266_v54 = vmul.f32 0.0051020407, %v217_v58  ;;  %v280_v7 = vld [vmem:[%s3482_s1 + $0x10] sm:$0xff] }
 0x133   :  { %2264 = vrsqrt.f32 %v296_v8 }
 0x134   :  { %v297_v18 = vadd.f32 1e-05, %v265_v31  ;;  %v298_v21 = vadd.f32 1e-05, %v266_v54 }
 0x135   :  { %v221_v14 = vpop.xlane.xlu1 %220  ;;  %v225_v27 = vpop.xlane.xlu0 %224 }
 0x136   :  { %v267_v1 = vmul.f32 0.0051020407, %v221_v14  ;;  %v268_v42 = vmul.f32 0.0051020407, %v225_v27  ;;  %2266 = vrsqrt.f32 %v297_v18  ;;  %v283_v27 = vld [vmem:[%s3482_s1 + $0x28] sm:$0xff] }
 0x137   :  { %2268 = vrsqrt.f32 %v298_v21 }
 0x138   :  { %v2261_v38 = vpop.eup %2260  ;;  %v299_v33 = vadd.f32 1e-05, %v267_v1  ;;  %v300_v28 = vadd.f32 1e-05, %v268_v42  ;;  %v281_v1 = vld [vmem:[%s3482_s1 + $0x18] sm:$0xff] }
 0x139   :  { %v229_v39 = vpop.xlane.xlu1 %228  ;;  %v326_v22 = vmul.f32 %v2261_v38, %v278_v2  ;;  %v233_v23 = vpop.xlane.xlu0 %232 }
 0x13a   :  { %2270 = vrsqrt.f32 %v299_v33  ;;  %v269_v48 = vmul.f32 0.0051020407, %v229_v39  ;;  %v270_v60 = vmul.f32 0.0051020407, %v233_v23  ;;  %v282_v39 = vld [vmem:[%s3482_s1 + $0x20] sm:$0xff] }
 0x13b   :  { %344 = vperm.xlu0 %2241, %v326_v22   ;;  %2272 = vrsqrt.f32 %v300_v28 }
 0x13c   :  { %v2263_v10 = vpop.eup %2262  ;;  %v301_v50 = vadd.f32 1e-05, %v269_v48  ;;  %v302_v47 = vadd.f32 1e-05, %v270_v60 }
 0x13d   :  { %v237_v11 = vpop.xlane.xlu1 %236  ;;  %v327_v52 = vmul.f32 %v2263_v10, %v279_v55  ;;  %v241_v63 = vpop.xlane.xlu0 %240  ;;  %v285_v10 = vld [vmem:[%s3482_s1 + $0x38] sm:$0xff] }
 0x13e   :  { %v2265_v34 = vpop.eup %2264  ;;  %2274 = vrsqrt.f32 %v301_v50  ;;  %v271_v30 = vmul.f32 0.0051020407, %v237_v11  ;;  %v272_v8 = vmul.f32 0.0051020407, %v241_v63  ;;  %v284_v63 = vld [vmem:[%s3482_s1 + $0x30] sm:$0xff] }
 0x13f   :  { %349 = vperm.xlu1 %2240, %v327_v52   ;;  %537 = vperm.xlu0 %2241, %v467_v46   ;;  %2276 = vrsqrt.f32 %v302_v47  ;;  %v328_v31 = vmul.f32 %v2265_v34, %v280_v7  ;;  %v287_v7 = vld [vmem:[%s3482_s1 + $0x48] sm:$0xff] }
 0x140   :  { %v303_v36 = vadd.f32 1e-05, %v271_v30  ;;  %v304_v54 = vadd.f32 1e-05, %v272_v8  ;;  %v2267_v14 = vpop.eup %2266 }
 0x141   :  { %v245_v58 = vpop.xlane.xlu1 %244  ;;  %v249_v18 = vpop.xlane.xlu0 %248  ;;  %v329_v23 = vmul.f32 %v2267_v14, %v281_v1  ;;  %v288_v1 = vld [vmem:[%s3482_s1 + $0x50] sm:$0xff] }
 0x142   :  { %2278 = vrsqrt.f32 %v303_v36  ;;  %v273_v21 = vmul.f32 0.0051020407, %v245_v58  ;;  %v274_v2 = vmul.f32 0.0051020407, %v249_v18  ;;  %v2269_v42 = vpop.eup %2268  ;;  %v289_v18 = vld [vmem:[%s3482_s1 + $0x58] sm:$0xff] }
 0x143   :  { %354 = vperm.xlu1 %2240, %v328_v31   ;;  %2280 = vrsqrt.f32 %v304_v54  ;;  %v330_v11 = vmul.f32 %v2269_v42, %v282_v39  ;;  %v286_v31 = vld [vmem:[%s3482_s1 + $0x40] sm:$0xff]  ;;  %v291_v42 = vld [vmem:[%s3482_s1 + $0x68] sm:$0xff] }
 0x144   :  { %v2271_v38 = vpop.eup %2270  ;;  %v305_v33 = vadd.f32 1e-05, %v273_v21  ;;  %v306_v48 = vadd.f32 1e-05, %v274_v2 }
 0x145   :  { %v253_v22 = vpop.xlane.xlu1 %252  ;;  %v331_v28 = vmul.f32 %v2271_v38, %v283_v27  ;;  %v257_v55 = vpop.xlane.xlu0 %256 }
 0x146   :  { %2282 = vrsqrt.f32 %v305_v33  ;;  %v275_v60 = vmul.f32 0.0051020407, %v253_v22  ;;  %v276_v50 = vmul.f32 0.0051020407, %v257_v55  ;;  %v2273_v46 = vpop.eup %2272  ;;  %v290_v22 = vld [vmem:[%s3482_s1 + $0x60] sm:$0xff]  ;;  %v292_v55 = vld [vmem:[%s3482_s1 + $0x70] sm:$0xff] }
 0x147   :  { %369 = vperm.xlu0 %2241, %v331_v28   ;;  %359 = vperm.xlu1 %2240, %v329_v23   ;;  %2284 = vrsqrt.f32 %v306_v48  ;;  %v332_v36 = vmul.f32 %v2273_v46, %v284_v63 }
 0x148   :  { %v2275_v52 = vpop.eup %2274  ;;  %v307_v47 = vadd.f32 1e-05, %v275_v60  ;;  %v308_v30 = vadd.f32 1e-05, %v276_v50 }
 0x149   :  { %v333_v34 = vmul.f32 %v2275_v52, %v285_v10  ;;  %v2277_v8 = vpop.eup %2276  ;;  %v468_v10 = vld [vmem:[%s3481_s2 + $0x70] sm:$0xff]  ;;  %v473_v50 = vpop.permute.xlu1 %472 }
 0x14a   :  { %2286 = vrsqrt.f32 %v307_v47  ;;  %v334_v21 = vmul.f32 %v2277_v8, %v286_v31 }
 0x14b   :  { %379 = vperm.xlu0 %2241, %v333_v34   ;;  %364 = vperm.xlu1 %2240, %v330_v11   ;;  %2288 = vrsqrt.f32 %v308_v30  ;;  %v293_v30 = vld [vmem:[%s3482_s1 + $0x78] sm:$0xff] }
 0x14c   :  { %v2279_v58 = vpop.eup %2278 }
 0x14d   :  { %v335_v54 = vmul.f32 %v2279_v58, %v287_v7  ;;  %v2281_v14 = vpop.eup %2280  ;;  %v478_v46 = vpop.permute.xlu1 %477 }
 0x14e   :  { %v336_v33 = vmul.f32 %v2281_v14, %v288_v1  ;;  %v498_v31 = vpop.permute.xlu0 %497 }
 0x14f   :  { %389 = vperm.xlu0 %2241, %v335_v54   ;;  %374 = vperm.xlu1 %2240, %v332_v36   ;;  %v469_v36 = vld [vmem:[%s3481_s2 + $0x78] sm:$0xff] }
 0x150   :  { %v2283_v27 = vpop.eup %2282 }
 0x151   :  { %v337_v2 = vmul.f32 %v2283_v27, %v289_v18  ;;  %v2285_v38 = vpop.eup %2284  ;;  %v483_v11 = vpop.permute.xlu1 %482 }
 0x152   :  { %v338_v23 = vmul.f32 %v2285_v38, %v290_v22  ;;  %v508_v18 = vpop.permute.xlu0 %507 }
 0x153   :  { %399 = vperm.xlu0 %2241, %v337_v2   ;;  %384 = vperm.xlu1 %2240, %v334_v21  }
 0x154   :  { %v2287_v39 = vpop.eup %2286 }
 0x155   :  { %v339_v28 = vmul.f32 %v2287_v39, %v291_v42  ;;  %v2289_v48 = vpop.eup %2288  ;;  %v488_v52 = vpop.permute.xlu1 %487 }
 0x156   :  { %v340_v60 = vmul.f32 %v2289_v48, %v292_v55  ;;  %v2833_v21 = vpop.permute.xlu0 %517 }
 0x157   :  { %409 = vperm.xlu0 %2241, %v339_v28   ;;  %394 = vperm.xlu1 %2240, %v336_v33  }
 0x15a   :  { %v2837_v1 = vpop.permute.xlu0 %527 }
 0x15b   :  { %404 = vperm.xlu1 %2240, %v338_v23  }
 0x15f   :  { %414 = vperm.xlu1 %2240, %v340_v60  }
 0x163   :  { %542 = vperm.xlu1 %2240, %v468_v10  }
 0x186   :  { %v261_v47 = vpop.xlane.xlu1 %260 }
 0x187   :  { %v277_v63 = vmul.f32 0.0051020407, %v261_v47 }
 0x189   :  { %v309_v34 = vadd.f32 1e-05, %v277_v63 }
 0x18a   :  { %v493_v58 = vpop.permute.xlu1 %492 }
 0x18b   :  { %2290 = vrsqrt.f32 %v309_v34 }
 0x18e   :  { %v2829_v54 = vpop.permute.xlu1 %502 }
 0x192   :  { %v2831_v14 = vpop.permute.xlu1 %512 }
 0x195   :  { %v2291_v7 = vpop.eup %2290 }
 0x196   :  { %v341_v8 = vmul.f32 %v2291_v7, %v293_v30  ;;  %v2835_v27 = vpop.permute.xlu1 %522 }
 0x198   :  { %419 = vperm.xlu0 %2241, %v341_v8  }
 0x19a   :  { %v2839_v2 = vpop.permute.xlu1 %532 }
 0x19c   :  { %547 = vperm.xlu0 %2241, %v469_v36  }
 0x1ba   :  { %v345_v42 = vpop.permute.xlu0 %344 }
 0x1bb   :  { %v422_v38 = vmul.f32 %v345_v42, %v2558_v13  ;;  %v423_v33 = vmul.f32 %v345_v42, %v2561_v15 }
 0x1bd   :  { %v550_v39 = vadd.f32 %v473_v50, %v422_v38  ;;  %v551_v22 = vadd.f32 %v473_v50, %v423_v33 }
 0x1be   :  { %v350_v28 = vpop.permute.xlu1 %349  ;;  %v2845_v55 = vpop.permute.xlu0 %537 }
 0x1bf   :  { %v424_v23 = vmul.f32 %v350_v28, %v2578_v32  ;;  %v425_v48 = vmul.f32 %v350_v28, %v2581_v4  ;;  %v582_v47 = vmax.f32 %v550_v39, 0.0  ;;  %v583_v63 = vmax.f32 %v551_v22, 0.0 }
 0x1c1   :  { %v552_v60 = vadd.f32 %v478_v46, %v424_v23  ;;  %v553_v10 = vadd.f32 %v478_v46, %v425_v48 }
 0x1c2   :  { %v355_v34 = vpop.permute.xlu1 %354 }
 0x1c3   :  { %v584_v30 = vmax.f32 %v552_v60, 0.0  ;;  %v585_v7 = vmax.f32 %v553_v10, 0.0  ;;  %v426_v13 = vmul.f32 %v355_v34, %v2564_v17  ;;  %v427_v15 = vmul.f32 %v355_v34, %v2567_v19 }
 0x1c5   :  { %v614_v8 = vpack.c.bf16 %v584_v30, %v582_v47  ;;  %v615_v50 = vpack.c.bf16 %v585_v7, %v583_v63  ;;  %v554_v36 = vadd.f32 %v483_v11, %v426_v13  ;;  %v555_v42 = vadd.f32 %v483_v11, %v427_v15 }
 0x1c6   :  { %v360_v32 = vpop.permute.xlu1 %359  ;;  %v370_v38 = vpop.permute.xlu0 %369 }
 0x1c7   :  { %647 = vst.msk [vmem:[#allocation2 + $0x10] sm:$0xff] %vm53_vm0, %v615_v50  ;;  %v428_v4 = vmul.f32 %v360_v32, %v2585_v35  ;;  %v429_v46 = vmul.f32 %v360_v32, %v2588_v37  ;;  %830 = vmatprep.subr.bf16.mxu0 %v614_v8  ;;  %2211 = vmatprep.subr.bf16.mxu1 %v614_v8  ;;  %v586_v39 = vmax.f32 %v554_v36, 0.0  ;;  %v587_v22 = vmax.f32 %v555_v42, 0.0 }
 0x1c8   :  { %v432_v33 = vmul.f32 %v370_v38, %v2607_v59  ;;  %v433_v17 = vmul.f32 %v370_v38, %v2610_v61  ;;  %831 = vmatpush1.bf16.msra.mxu0 %v2293_v3  ;;  %2219 = vmatpush1.bf16.msra.mxu1 %v2293_v3 }
 0x1c9   :  { %v556_v19 = vadd.f32 %v488_v52, %v428_v4  ;;  %v557_v11 = vadd.f32 %v488_v52, %v429_v46 }
 0x1ca   :  { %v560_v28 = vadd.f32 %v498_v31, %v432_v33  ;;  %v561_v23 = vadd.f32 %v498_v31, %v433_v17  ;;  %v365_v48 = vpop.permute.xlu1 %364  ;;  %v380_v35 = vpop.permute.xlu0 %379 }
 0x1cb   :  { %v588_v60 = vmax.f32 %v556_v19, 0.0  ;;  %v589_v37 = vmax.f32 %v557_v11, 0.0  ;;  %v430_v10 = vmul.f32 %v365_v48, %v2601_v56  ;;  %v431_v59 = vmul.f32 %v365_v48, %v2604_v57 }
 0x1cc   :  { %v436_v61 = vmul.f32 %v380_v35, %v2629_v29  ;;  %v437_v47 = vmul.f32 %v380_v35, %v2632_v0  ;;  %v592_v7 = vmax.f32 %v560_v28, 0.0  ;;  %v593_v13 = vmax.f32 %v561_v23, 0.0 }
 0x1cd   :  { %v616_v63 = vpack.c.bf16 %v588_v60, %v586_v39  ;;  %v617_v34 = vpack.c.bf16 %v589_v37, %v587_v22  ;;  %v558_v30 = vadd.f32 %v493_v58, %v430_v10  ;;  %v559_v52 = vadd.f32 %v493_v58, %v431_v59 }
 0x1ce   :  { %v564_v15 = vadd.f32 %v508_v18, %v436_v61  ;;  %v565_v31 = vadd.f32 %v508_v18, %v437_v47  ;;  %v375_v8 = vpop.permute.xlu1 %374  ;;  %v390_v50 = vpop.permute.xlu0 %389 }
 0x1cf   :  { %649 = vst.msk [vmem:[#allocation2 + $0x28] sm:$0xff] %vm53_vm0, %v617_v34  ;;  %v590_v36 = vmax.f32 %v558_v30, 0.0  ;;  %v591_v56 = vmax.f32 %v559_v52, 0.0  ;;  %v434_v57 = vmul.f32 %v375_v8, %v2622_v24  ;;  %v435_v29 = vmul.f32 %v375_v8, %v2625_v25  ;;  %832 = vmatprep.subr.bf16.mxu0 %v616_v63  ;;  %2212 = vmatprep.subr.bf16.mxu1 %v616_v63 }
 0x1d0   :  { %v440_v0 = vmul.f32 %v390_v50, %v2651_v49  ;;  %v441_v58 = vmul.f32 %v390_v50, %v2654_v51  ;;  %833 = vmatpush1.bf16.msra.mxu0 %v2293_v3  ;;  %2220 = vmatpush1.bf16.msra.mxu1 %v2293_v3  ;;  %v596_v4 = vmax.f32 %v564_v15, 0.0  ;;  %v597_v24 = vmax.f32 %v565_v31, 0.0 }
 0x1d1   :  { %v618_v18 = vpack.c.bf16 %v592_v7, %v590_v36  ;;  %v619_v42 = vpack.c.bf16 %v593_v13, %v591_v56  ;;  %v562_v32 = vadd.f32 %v2829_v54, %v434_v57  ;;  %v563_v38 = vadd.f32 %v2829_v54, %v435_v29 }
 0x1d2   :  { %v568_v25 = vadd.f32 %v2833_v21, %v440_v0  ;;  %v569_v46 = vadd.f32 %v2833_v21, %v441_v58  ;;  %v385_v33 = vpop.permute.xlu1 %384  ;;  %v400_v49 = vpop.permute.xlu0 %399  ;;  %v1328_v0 = vld [vmem:[%s3484_s4] sm:$0xf]  ;;  %s2297_s4 = smov 1  }
 0x1d3   :  { %651 = vst.msk [vmem:[#allocation2 + $0x40] sm:$0xff] %vm53_vm0, %v619_v42  ;;  %v594_v51 = vmax.f32 %v562_v32, 0.0  ;;  %v595_v17 = vmax.f32 %v563_v38, 0.0  ;;  %v438_v19 = vmul.f32 %v385_v33, %v2644_v5  ;;  %v439_v11 = vmul.f32 %v385_v33, %v2647_v6  ;;  %834 = vmatprep.subr.bf16.mxu0 %v618_v18  ;;  %2213 = vmatprep.subr.bf16.mxu1 %v618_v18 }
 0x1d4   :  { %v444_v54 = vmul.f32 %v400_v49, %v2673_v16  ;;  %v445_v39 = vmul.f32 %v400_v49, %v2676_v20  ;;  %835 = vmatpush1.bf16.msra.mxu0 %v2293_v3  ;;  %2221 = vmatpush1.bf16.msra.mxu1 %v2293_v3  ;;  %v600_v48 = vmax.f32 %v568_v25, 0.0  ;;  %v601_v5 = vmax.f32 %v569_v46, 0.0 }
 0x1d5   :  { %v620_v21 = vpack.c.bf16 %v596_v4, %v594_v51  ;;  %v621_v22 = vpack.c.bf16 %v597_v24, %v595_v17  ;;  %v566_v28 = vadd.f32 %v2831_v14, %v438_v19  ;;  %v567_v23 = vadd.f32 %v2831_v14, %v439_v11 }
 0x1d6   :  { %v572_v6 = vadd.f32 %v2837_v1, %v444_v54  ;;  %v573_v35 = vadd.f32 %v2837_v1, %v445_v39  ;;  %v395_v60 = vpop.permute.xlu1 %394  ;;  %v410_v16 = vpop.permute.xlu0 %409 }
 0x1d7   :  { %653 = vst.msk [vmem:[#allocation2 + $0x58] sm:$0xff] %vm53_vm0, %v621_v22  ;;  %v598_v20 = vmax.f32 %v566_v28, 0.0  ;;  %v599_v37 = vmax.f32 %v567_v23, 0.0  ;;  %v442_v10 = vmul.f32 %v395_v60, %v2666_v9  ;;  %v443_v59 = vmul.f32 %v395_v60, %v2669_v12  ;;  %836 = vmatprep.subr.bf16.mxu0 %v620_v21  ;;  %2214 = vmatprep.subr.bf16.mxu1 %v620_v21 }
 0x1d8   :  { %v448_v14 = vmul.f32 %v410_v16, %v2695_v43  ;;  %v449_v61 = vmul.f32 %v410_v16, %v2698_v45  ;;  %837 = vmatpush1.bf16.msra.mxu0 %v2293_v3  ;;  %2222 = vmatpush1.bf16.msra.mxu1 %v2293_v3  ;;  %v604_v30 = vmax.f32 %v572_v6, 0.0  ;;  %v605_v9 = vmax.f32 %v573_v35, 0.0 }
 0x1d9   :  { %v622_v1 = vpack.c.bf16 %v600_v48, %v598_v20  ;;  %v623_v47 = vpack.c.bf16 %v601_v5, %v599_v37  ;;  %v570_v63 = vadd.f32 %v2835_v27, %v442_v10  ;;  %v571_v34 = vadd.f32 %v2835_v27, %v443_v59  ;;  %v700_v37 = vld [vmem:[#allocation2 + $0x10] sm:$0xff]  ;;  %v703_v10 = vld [vmem:[#allocation2 + $0x28] sm:$0xff] }
 0x1da   :  { %v576_v12 = vadd.f32 %v2845_v55, %v448_v14  ;;  %v577_v52 = vadd.f32 %v2845_v55, %v449_v61  ;;  %v405_v7 = vpop.permute.xlu1 %404  ;;  %v2244_v59 = vld [vmem:[%s3483_s3 + $0x8] sm:$0xff]   ;;  %v2941_v14 = vld [vmem:[%s3483_s3 + $0x78] sm:$0xff]   ;;  %v706_v61 = vld [vmem:[#allocation2 + $0x40] sm:$0xff] }
 0x1db   :  { %655 = vst.msk [vmem:[#allocation2 + $0x70] sm:$0xff] %vm53_vm0, %v623_v47  ;;  %v602_v43 = vmax.f32 %v570_v63, 0.0  ;;  %v603_v45 = vmax.f32 %v571_v34, 0.0  ;;  %v446_v13 = vmul.f32 %v405_v7, %v2688_v41  ;;  %v447_v15 = vmul.f32 %v405_v7, %v2691_v26  ;;  %838 = vmatprep.subr.bf16.mxu0 %v622_v1  ;;  %2215 = vmatprep.subr.bf16.mxu1 %v622_v1  ;;  %v2901_v26 = vld [vmem:[#allocation2] sm:$0xff]  ;;  %v2246_v47 = vld [vmem:[%s3483_s3 + $0x10] sm:$0xff]  }
 0x1dc   :  { %839 = vmatpush1.bf16.msra.mxu0 %v2293_v3  ;;  %2223 = vmatpush1.bf16.msra.mxu1 %v2293_v3  ;;  %v608_v50 = vmax.f32 %v576_v12, 0.0  ;;  %v609_v36 = vmax.f32 %v577_v52, 0.0  ;;  %v2952_v63 = vld [vmem:[%s3483_s3 + $0x80] sm:$0xff]   ;;  %v2249_v12 = vld [vmem:[%s3483_s3 + $0x88] sm:$0xff]  }
 0x1dd   :  { %v624_v27 = vpack.c.bf16 %v604_v30, %v602_v43  ;;  %v625_v31 = vpack.c.bf16 %v605_v9, %v603_v45  ;;  %v574_v8 = vadd.f32 %v2839_v2, %v446_v13  ;;  %v575_v55 = vadd.f32 %v2839_v2, %v447_v15  ;;  %v2248_v9 = vld [vmem:[%s3483_s3 + $0x18] sm:$0xff]   ;;  %v2250_v43 = vld [vmem:[%s3483_s3 + $0x20] sm:$0xff]   ;;  %v2251_v45 = vld [vmem:[%s3483_s3 + $0x28] sm:$0xff]  }
 0x1de   :  { %v1342_v2 = vlaneseq  ;;  %v415_v51 = vpop.permute.xlu1 %414  ;;  %v709_v1 = vld [vmem:[#allocation2 + $0x58] sm:$0xff]  ;;  %v2252_v13 = vld [vmem:[%s3483_s3 + $0x30] sm:$0xff]  }
 0x1df   :  { %657 = vst.msk [vmem:[#allocation2 + $0x88] sm:$0xff] %vm53_vm0, %v625_v31  ;;  %v606_v56 = vmax.f32 %v574_v8, 0.0  ;;  %v607_v41 = vmax.f32 %v575_v55, 0.0  ;;  %840 = vmatprep.subr.bf16.mxu0 %v624_v27  ;;  %2216 = vmatprep.subr.bf16.mxu1 %v624_v27  ;;  %v450_v54 = vmul.f32 %v415_v51, %v2710_v53  ;;  %v451_v39 = vmul.f32 %v415_v51, %v2713_v62  ;;  %v2253_v15 = vld [vmem:[%s3483_s3 + $0x38] sm:$0xff]   ;;  %v2254_v27 = vld [vmem:[%s3483_s3 + $0x40] sm:$0xff]   ;;  %v2255_v31 = vld [vmem:[%s3483_s3 + $0x48] sm:$0xff]  }
 0x1e0   :  { %841 = vmatpush1.bf16.msra.mxu0 %v2901_v26  ;;  %2224 = vmatpush1.bf16.msra.mxu1 %v2901_v26  ;;  %v1343_v29 = vshrl.u32 %v1342_v2, 7  ;;  %v2256_v8 = vld [vmem:[%s3483_s3 + $0x50] sm:$0xff]   ;;  %v2257_v55 = vld [vmem:[%s3483_s3 + $0x58] sm:$0xff]  }
 0x1e1   :  { %v626_v3 = vpack.c.bf16 %v608_v50, %v606_v56  ;;  %v627_v57 = vpack.c.bf16 %v609_v36, %v607_v41  ;;  %v2258_v50 = vld [vmem:[%s3483_s3 + $0x60] sm:$0xff]   ;;  %v2259_v36 = vld [vmem:[%s3483_s3 + $0x68] sm:$0xff]  }
 0x1e2   :  { %v1344_v58 = vsub.s32 0, %v1343_v29  ;;  %v1348_v42 = vsub.s32 2, %v1343_v29  ;;  %v1490_v38 = vsub.s32 1, %v1343_v29  ;;  %v1494_v33 = vsub.s32 3, %v1343_v29  ;;  %v543_v19 = vpop.permute.xlu1 %542  ;;  %v712_v34 = vld [vmem:[#allocation2 + $0x70] sm:$0xff] }
 0x1e3   :  { %659 = vst.msk [vmem:[#allocation2 + $0xa0] sm:$0xff] %vm53_vm0, %v627_v57  ;;  %842 = vmatprep.subr.bf16.mxu0 %v626_v3  ;;  %2217 = vmatprep.subr.bf16.mxu1 %v626_v3  ;;  %v578_v21 = vadd.f32 %v543_v19, %v450_v54  ;;  %v579_v22 = vadd.f32 %v543_v19, %v451_v39 }
 0x1e4   :  { %843 = vmatpush1.bf16.msra.mxu0 %v2901_v26  ;;  %2225 = vmatpush1.bf16.msra.mxu1 %v2901_v26  ;;  %v1345_v18 = vrot.slane %v1328_v0, %v1344_v58  ;;  %v1349_v4 = vrot.slane %v1328_v0, %v1348_v42  ;;  %v1491_v24 = vrot.slane %v1328_v0, %v1490_v38 }
 0x1e5   :  { %v1495_v49 = vrot.slane %v1328_v0, %v1494_v33  ;;  %v610_v35 = vmax.f32 %v578_v21, 0.0  ;;  %v611_v60 = vmax.f32 %v579_v22, 0.0 }
 0x1e6   :  { %v1355_v32 = vrot.slane %v1345_v18, %v1344_v58  ;;  %v1359_v25 = vrot.slane %v1349_v4, %v1344_v58  ;;  %v1501_v46 = vrot.slane %v1491_v24, %v1490_v38  ;;  %v715_v30 = vld [vmem:[#allocation2 + $0x88] sm:$0xff] }
 0x1e7   :  { %v1505_v17 = vrot.slane %v1495_v49, %v1490_v38 }
 0x1e8   :  { %1362 = vrot.lane.b32.xlu1 %v1355_v32, %s2294_s18  ;;  %1364 = vrot.lane.b32.xlu0 %v1359_v25, %s2294_s18 }
 0x1ea   :  { %v718_v52 = vld [vmem:[#allocation2 + $0xa0] sm:$0xff] }
 0x1ec   :  { %1508 = vrot.lane.b32.xlu1 %v1501_v46, %s2295_s19  ;;  %1510 = vrot.lane.b32.xlu0 %v1505_v17, %s2295_s19 }
 0x1f0   :  { %1610 = vrot.lane.b32.xlu1 %v1355_v32, %s2296_s20  ;;  %1612 = vrot.lane.b32.xlu0 %v1359_v25, %s2296_s20 }
 0x1f4   :  { %1767 = vrot.lane.b32.xlu1 %v1501_v46, %s2297_s4  ;;  %1769 = vrot.lane.b32.xlu0 %v1505_v17, %s2297_s4 }
 0x1f8   :  { %1844 = vrot.lane.b32.xlu1 %v1355_v32, %s2298_s21  ;;  %1846 = vrot.lane.b32.xlu0 %v1359_v25, %s2298_s21 }
 0x1fc   :  { %1982 = vrot.lane.b32.xlu1 %v1501_v46, %s2299_s22  ;;  %1984 = vrot.lane.b32.xlu0 %v1505_v17, %s2299_s22 }
 0x217   :  { %v420_v11 = vpop.permute.xlu0 %419 }
 0x218   :  { %v452_v28 = vmul.f32 %v420_v11, %v2750_v44  ;;  %v453_v23 = vmul.f32 %v420_v11, %v2747_v40  ;;  %v2242_v44 = vld [vmem:[%s3483_s3] sm:$0xff]   ;;  %v2927_v40 = vld [vmem:[%s3483_s3 + $0x70] sm:$0xff]   ;;  %s2300_s3 = smov 99  }
 0x21b   :  { %v548_v48 = vpop.permute.xlu0 %547 }
 0x21c   :  { %v580_v5 = vadd.f32 %v548_v48, %v452_v28  ;;  %v581_v6 = vadd.f32 %v548_v48, %v453_v23 }
 0x21e   :  { %v612_v53 = vmax.f32 %v580_v5, 0.0  ;;  %v613_v16 = vmax.f32 %v581_v6, 0.0 }
 0x220   :  { %v628_v62 = vpack.c.bf16 %v612_v53, %v610_v35  ;;  %v629_v20 = vpack.c.bf16 %v613_v16, %v611_v60 }
 0x222   :  { %661 = vst.msk [vmem:[#allocation2 + $0xb8] sm:$0xff] %vm53_vm0, %v629_v20  ;;  %844 = vmatprep.subr.bf16.mxu0 %v628_v62  ;;  %2218 = vmatprep.subr.bf16.mxu1 %v628_v62 }
 0x223   :  { %845 = vmatpush1.bf16.msra.mxu0 %v2901_v26  ;;  %2226 = vmatpush1.bf16.msra.mxu1 %v2901_v26 }
 0x224   :  { %2159 = vmatprep.subr.bf16.mxu1 %v700_v37 }
 0x226   :  { %863 = vmatmul.mubr.bf16.vlgmr.msra.gmra.mrb[0].mxu0 %v2242_v44  ;;  %1003 = vmatmul.mubr.bf16.vlgmr.msra.gmra.mrb[0].mxu1 %v2927_v40 }
 0x227   :  { %2160 = vmatpush3.bf16.msra.mxu1 %v700_v37  ;;  %872 = vmatprep.mubr.bf16.mxu0 %v2901_v26 }
 0x228   :  { %2161 = vmatprep.subr.bf16.mxu1 %v703_v10  ;;  %1012 = vmatprep.mubr.bf16.mxu1 %v2901_v26 }
 0x229   :  { %v721_v7 = vld [vmem:[#allocation2 + $0xb8] sm:$0xff] }
 0x22b   :  { %2162 = vmatpush3.bf16.msra.mxu1 %v703_v10 }
 0x22c   :  { %2163 = vmatprep.subr.bf16.mxu1 %v706_v61 }
 0x22e   :  { %873 = vmatmul.mubr.bf16.gmra.mrb[4].mxu0 %v2244_v59  ;;  %1013 = vmatmul.mubr.bf16.gmra.mrb[4].mxu1 %v2941_v14 }
 0x22f   :  { %2164 = vmatpush3.bf16.msra.mxu1 %v706_v61  ;;  %882 = vmatprep.mubr.bf16.mxu0 %v2901_v26 }
 0x230   :  { %2165 = vmatprep.subr.bf16.mxu1 %v709_v1  ;;  %1022 = vmatprep.mubr.bf16.mxu1 %v2901_v26 }
 0x233   :  { %2166 = vmatpush3.bf16.msra.mxu1 %v709_v1 }
 0x234   :  { %2167 = vmatprep.subr.bf16.mxu1 %v712_v34 }
 0x236   :  { %883 = vmatmul.mubr.bf16.gmra.mrb[8].mxu0 %v2246_v47  ;;  %1023 = vmatmul.mubr.bf16.gmra.mrb[8].mxu1 %v2952_v63 }
 0x237   :  { %2168 = vmatpush3.bf16.msra.mxu1 %v712_v34  ;;  %892 = vmatprep.mubr.bf16.mxu0 %v2901_v26 }
 0x238   :  { %2169 = vmatprep.subr.bf16.mxu1 %v715_v30  ;;  %1032 = vmatprep.mubr.bf16.mxu1 %v2901_v26 }
 0x23b   :  { %2170 = vmatpush3.bf16.msra.mxu1 %v715_v30 }
 0x23c   :  { %2171 = vmatprep.subr.bf16.mxu1 %v718_v52 }
 0x23e   :  { %893 = vmatmul.mubr.bf16.gmra.mrb[12].mxu0 %v2248_v9  ;;  %1033 = vmatmul.mubr.bf16.gmra.mrb[12].mxu1 %v2249_v12 }
 0x23f   :  { %2172 = vmatpush3.bf16.msra.mxu1 %v718_v52  ;;  %902 = vmatprep.mubr.bf16.mxu0 %v2901_v26 }
 0x240   :  { %2173 = vmatprep.subr.bf16.mxu1 %v721_v7  ;;  %2175 = vmatprep.mubr.bf16.mxu1 %v2242_v44 }
 0x243   :  { %2174 = vmatpush3.bf16.msra.mxu1 %v721_v7 }
 0x246   :  { %903 = vmatmul.mubr.bf16.gmra.mrb[16].mxu0 %v2250_v43  ;;  %2176 = vmatmul.mubr.bf16.vlgmr.msra.gmra.mrb[16].mxu1 %v2244_v59 }
 0x247   :  { %912 = vmatprep.mubr.bf16.mxu0 %v2901_v26  ;;  %2179 = vmatprep.mubr.bf16.mxu1 %v2246_v47 }
 0x24e   :  { %913 = vmatmul.mubr.bf16.gmra.mrb[20].mxu0 %v2251_v45  ;;  %2180 = vmatmul.mubr.bf16.gmra.mrb[20].mxu1 %v2248_v9 }
 0x24f   :  { %922 = vmatprep.mubr.bf16.mxu0 %v2901_v26  ;;  %2183 = vmatprep.mubr.bf16.mxu1 %v2250_v43 }
 0x256   :  { %923 = vmatmul.mubr.bf16.gmra.mrb[24].mxu0 %v2252_v13  ;;  %2184 = vmatmul.mubr.bf16.gmra.mrb[24].mxu1 %v2251_v45 }
 0x257   :  { %932 = vmatprep.mubr.bf16.mxu0 %v2901_v26  ;;  %2187 = vmatprep.mubr.bf16.mxu1 %v2252_v13 }
 0x25a   :  { %v3006_v56 = vpop.permute.xlu1 %1362  ;;  %v3042_v5 = vpop.permute.xlu0 %1364 }
 0x25e   :  { %933 = vmatmul.mubr.bf16.gmra.mrb[28].mxu0 %v2253_v15  ;;  %2188 = vmatmul.mubr.bf16.gmra.mrb[28].mxu1 %v2253_v15  ;;  %v3008_v41 = vpop.permute.xlu1 %1508  ;;  %v3050_v10 = vpop.permute.xlu0 %1510 }
 0x25f   :  { %942 = vmatprep.mubr.bf16.mxu0 %v2901_v26  ;;  %2191 = vmatprep.mubr.bf16.mxu1 %v2254_v27  ;;  %v3056_v59 = vsel %vm1512_vm1, %v3008_v41, %v3050_v10 }
 0x262   :  { %v3010_v3 = vpop.permute.xlu1 %1610 }
 0x266   :  { %943 = vmatmul.mubr.bf16.gmra.mrb[32].mxu0 %v2254_v27  ;;  %2192 = vmatmul.mubr.bf16.gmra.mrb[32].mxu1 %v2255_v31  ;;  %v3022_v32 = vpop.permute.xlu1 %1767 }
 0x267   :  { %952 = vmatprep.mubr.bf16.mxu0 %v2901_v26  ;;  %2195 = vmatprep.mubr.bf16.mxu1 %v2256_v8 }
 0x26a   :  { %v3034_v17 = vpop.permute.xlu1 %1844 }
 0x26e   :  { %953 = vmatmul.mubr.bf16.gmra.mrb[36].mxu0 %v2255_v31  ;;  %2196 = vmatmul.mubr.bf16.gmra.mrb[36].mxu1 %v2257_v55  ;;  %v3038_v48 = vpop.permute.xlu1 %1982 }
 0x26f   :  { %962 = vmatprep.mubr.bf16.mxu0 %v2901_v26  ;;  %2199 = vmatprep.mubr.bf16.mxu1 %v2258_v50 }
 0x276   :  { %963 = vmatmul.mubr.bf16.gmra.mrb[40].mxu0 %v2256_v8  ;;  %2200 = vmatmul.mubr.bf16.gmra.mrb[40].mxu1 %v2259_v36 }
 0x277   :  { %972 = vmatprep.mubr.bf16.mxu0 %v2901_v26  ;;  %2203 = vmatprep.mubr.bf16.mxu1 %v2927_v40 }
 0x27e   :  { %973 = vmatmul.mubr.bf16.gmra.mrb[44].mxu0 %v2257_v55  ;;  %2204 = vmatmul.mubr.bf16.gmra.mrb[44].mxu1 %v2941_v14 }
 0x27f   :  { %982 = vmatprep.mubr.bf16.mxu0 %v2901_v26  ;;  %2207 = vmatprep.mubr.bf16.mxu1 %v2952_v63 }
 0x286   :  { %983 = vmatmul.mubr.bf16.gmra.mrb[48].mxu0 %v2258_v50  ;;  %2208 = vmatmul.mubr.bf16.gmra.mrb[48].mxu1 %v2249_v12 }
 0x287   :  { %992 = vmatprep.mubr.bf16.mxu0 %v2901_v26 }
 0x28e   :  { %993 = vmatmul.mubr.bf16.gmra.mrb[52].mxu0 %v2259_v36 }
 0x2f9   :  { %v3012_v57 = vpop.f32.mrb[0].mxu0  ;;  %v1004_v2 = vpop.f32.mrb[0].mxu1 }
 0x2fa   :  { %v3014_v29 = vpop.f32.mrb[1].mxu0  ;;  %v1006_v0 = vpop.f32.mrb[1].mxu1 }
 0x2fb   :  { %1929 = vrot.lane.b32.xlu1 %v1006_v0, %s2300_s3  ;;  %v3017_v58 = vpop.f32.mrb[2].mxu0  ;;  %v1008_v18 = vpop.f32.mrb[2].mxu1 }
 0x2fc   :  { %v3019_v26 = vpop.f32.mrb[3].mxu0  ;;  %v1010_v42 = vpop.f32.mrb[3].mxu1 }
 0x2ff   :  { %1933 = vrot.lane.b32.xlu1 %v1010_v42, %s2300_s3 }
 0x301   :  { %v3024_v38 = vpop.f32.mrb[4].mxu0  ;;  %v1014_v4 = vpop.f32.mrb[4].mxu1 }
 0x302   :  { %v3026_v24 = vpop.f32.mrb[5].mxu0  ;;  %v1016_v25 = vpop.f32.mrb[5].mxu1 }
 0x303   :  { %1937 = vrot.lane.b32.xlu1 %v1016_v25, %s2300_s3  ;;  %v3029_v46 = vpop.f32.mrb[6].mxu0  ;;  %v1018_v33 = vpop.f32.mrb[6].mxu1 }
 0x304   :  { %v3031_v49 = vpop.f32.mrb[7].mxu0  ;;  %v1020_v51 = vpop.f32.mrb[7].mxu1 }
 0x307   :  { %1941 = vrot.lane.b32.xlu1 %v1020_v51, %s2300_s3 }
 0x309   :  { %v884_v19 = vpop.f32.mrb[8].mxu0  ;;  %v1024_v11 = vpop.f32.mrb[8].mxu1 }
 0x30a   :  { %v886_v54 = vpop.f32.mrb[9].mxu0  ;;  %v1026_v39 = vpop.f32.mrb[9].mxu1 }
 0x30b   :  { %v1028_v21 = vpop.f32.mrb[10].mxu1  ;;  %1419 = vrot.lane.b32.xlu1 %v884_v19, %s2296_s20  ;;  %1421 = vrot.lane.b32.xlu0 %v886_v54, %s2296_s20  ;;  %v888_v22 = vpop.f32.mrb[10].mxu0  ;;  %v1990_v6 = vmul.f32 %v3038_v48, %v1026_v39 }
 0x30c   :  { %v890_v28 = vpop.f32.mrb[11].mxu0  ;;  %v1030_v23 = vpop.f32.mrb[11].mxu1 }
 0x30d   :  { %v1992_v37 = vmul.f32 %v3038_v48, %v1030_v23  ;;  %v3082_v11 = vpop.permute.xlu0 %1612 }
 0x30f   :  { %1425 = vrot.lane.b32.xlu0 %v888_v22, %s2296_s20  ;;  %1427 = vrot.lane.b32.xlu1 %v890_v28, %s2296_s20  ;;  %v3092_v22 = vsel %vm1443_vm2, %v3010_v3, %v3082_v11 }
 0x311   :  { %v894_v35 = vpop.f32.mrb[12].mxu0  ;;  %v1034_v60 = vpop.f32.mrb[12].mxu1 }
 0x312   :  { %v896_v53 = vpop.f32.mrb[13].mxu0  ;;  %v1036_v16 = vpop.f32.mrb[13].mxu1 }
 0x313   :  { %v1038_v62 = vpop.f32.mrb[14].mxu1  ;;  %2006 = vrot.lane.b32.xlu1 %v1990_v6, %s2301_s7  ;;  %1433 = vrot.lane.b32.xlu0 %v896_v53, %s2296_s20  ;;  %v898_v20 = vpop.f32.mrb[14].mxu0  ;;  %v1994_v7 = vmul.f32 %v3038_v48, %v1036_v16 }
 0x314   :  { %v900_v44 = vpop.f32.mrb[15].mxu0  ;;  %v3047_v40 = vpop.f32.mrb[15].mxu1 }
 0x317   :  { %2010 = vrot.lane.b32.xlu1 %v1992_v37, %s2301_s7  ;;  %1437 = vrot.lane.b32.xlu0 %v898_v20, %s2296_s20 }
 0x319   :  { %v904_v14 = vpop.f32.mrb[16].mxu0  ;;  %v3058_v61 = vpop.f32.mrb[16].mxu1 }
 0x31a   :  { %v906_v1 = vpop.f32.mrb[17].mxu0  ;;  %v3060_v47 = vpop.f32.mrb[17].mxu1  ;;  %v1517_v50 = vmul.f32 %v3008_v41, %v904_v14 }
 0x31b   :  { %v1518_v63 = vmul.f32 %v3056_v59, %v906_v1  ;;  %v3063_v34 = vpop.f32.mrb[18].mxu1  ;;  %1431 = vrot.lane.b32.xlu1 %v894_v35, %s2296_s20  ;;  %v908_v30 = vpop.f32.mrb[18].mxu0 }
 0x31c   :  { %v910_v9 = vpop.f32.mrb[19].mxu0  ;;  %v3066_v12 = vpop.f32.mrb[19].mxu1  ;;  %v1520_v52 = vmul.f32 %v3008_v41, %v908_v30 }
 0x31d   :  { %1543 = vrot.lane.b32.xlu0 %v1518_v63, %s2302_s8  ;;  %v1521_v36 = vmul.f32 %v3056_v59, %v910_v9 }
 0x31f   :  { %1439 = vrot.lane.b32.xlu1 %v900_v44, %s2296_s20 }
 0x321   :  { %v914_v43 = vpop.f32.mrb[20].mxu0  ;;  %v2181_v45 = vpop.f32.mrb[20].mxu1  ;;  %1547 = vrot.lane.b32.xlu0 %v1520_v52, %s2302_s8 }
 0x322   :  { %v916_v13 = vpop.f32.mrb[21].mxu0  ;;  %v1093_v15 = vpop.f32.mrb[21].mxu1  ;;  %v1523_v62 = vmul.f32 %v3008_v41, %v914_v43 }
 0x323   :  { %v2182_v27 = vpop.f32.mrb[22].mxu1  ;;  %2014 = vrot.lane.b32.xlu1 %v1994_v7, %s2301_s7  ;;  %v918_v31 = vpop.f32.mrb[22].mxu0  ;;  %v1524_v4 = vmul.f32 %v3056_v59, %v916_v13 }
 0x324   :  { %v920_v8 = vpop.f32.mrb[23].mxu0  ;;  %v1096_v55 = vpop.f32.mrb[23].mxu1  ;;  %v1526_v54 = vmul.f32 %v3008_v41, %v918_v31 }
 0x325   :  { %1441 = vrot.lane.b32.xlu0 %v2182_v27, %s2296_s20  ;;  %v1527_v44 = vmul.f32 %v3056_v59, %v920_v8 }
 0x327   :  { %1541 = vrot.lane.b32.xlu1 %v1517_v50, %s2302_s8 }
 0x329   :  { %v924_v2 = vpop.f32.mrb[24].mxu0  ;;  %v2185_v0 = vpop.f32.mrb[24].mxu1  ;;  %1429 = vrot.lane.b32.xlu0 %v1096_v55, %s2296_s20 }
 0x32a   :  { %v926_v18 = vpop.f32.mrb[25].mxu0  ;;  %v1109_v42 = vpop.f32.mrb[25].mxu1  ;;  %v1525_v59 = vmul.f32 %v2185_v0, %v3050_v10 }
 0x32b   :  { %v928_v25 = vpop.f32.mrb[26].mxu0  ;;  %v2186_v33 = vpop.f32.mrb[26].mxu1  ;;  %1549 = vrot.lane.b32.xlu1 %v1521_v36, %s2302_s8  ;;  %v1619_v6 = vmul.f32 %v3092_v22, %v926_v18 }
 0x32c   :  { %v930_v51 = vpop.f32.mrb[27].mxu0  ;;  %v1112_v19 = vpop.f32.mrb[27].mxu1  ;;  %v1528_v20 = vmul.f32 %v2186_v33, %v3050_v10  ;;  %v1621_v30 = vmul.f32 %v3010_v3, %v928_v25 }
 0x32d   :  { %1555 = vrot.lane.b32.xlu0 %v1524_v4, %s2302_s8  ;;  %v1522_v43 = vmul.f32 %v3050_v10, %v1112_v19  ;;  %v1622_v4 = vmul.f32 %v3092_v22, %v930_v51 }
 0x32f   :  { %1435 = vrot.lane.b32.xlu1 %v2181_v45, %s2296_s20  ;;  %v1618_v45 = vmul.f32 %v3010_v3, %v924_v2  ;;  %v1519_v2 = vmul.f32 %v3050_v10, %v1109_v42 }
 0x331   :  { %v934_v39 = vpop.f32.mrb[28].mxu0  ;;  %v3086_v21 = vpop.f32.mrb[28].mxu1  ;;  %1559 = vrot.lane.b32.xlu0 %v1526_v54, %s2302_s8 }
 0x332   :  { %v936_v28 = vpop.f32.mrb[29].mxu0  ;;  %v3094_v23 = vpop.f32.mrb[29].mxu1  ;;  %v1624_v51 = vmul.f32 %v3010_v3, %v934_v39 }
 0x333   :  { %v938_v35 = vpop.f32.mrb[30].mxu0  ;;  %v2190_v60 = vpop.f32.mrb[30].mxu1  ;;  %1423 = vrot.lane.b32.xlu1 %v1093_v15, %s2296_s20  ;;  %v1625_v8 = vmul.f32 %v3092_v22, %v936_v28  ;;  %s2304_s20 = smov 112  }
 0x334   :  { %v3098_v53 = vpop.f32.mrb[31].mxu0  ;;  %v1128_v16 = vpop.f32.mrb[31].mxu1  ;;  %v1627_v18 = vmul.f32 %v3010_v3, %v938_v35  ;;  %v1629_v28 = vmul.f32 %v2190_v60, %v3082_v11 }
 0x335   :  { %1644 = vrot.lane.b32.xlu0 %v1619_v6, %s2303_s9 }
 0x337   :  { %1553 = vrot.lane.b32.xlu1 %v1523_v62, %s2302_s8  ;;  %v1623_v62 = vmul.f32 %v3082_v11, %v1128_v16 }
 0x339   :  { %1563 = vrot.lane.b32.xlu0 %v1528_v20, %s2302_s8  ;;  %v2193_v37 = vpop.f32.mrb[32].mxu1  ;;  %v944_v14 = vpop.f32.mrb[32].mxu0  ;;  %v1626_v20 = vmul.f32 %v3086_v21, %v3082_v11  ;;  %v1628_v21 = vmul.f32 %v3092_v22, %v3098_v53 }
 0x33a   :  { %v1141_v1 = vpop.f32.mrb[33].mxu1  ;;  %v3106_v63 = vpop.f32.mrb[33].mxu0 }
 0x33b   :  { %1561 = vrot.lane.b32.xlu1 %v1527_v44, %s2302_s8  ;;  %v3110_v41 = vpop.f32.mrb[34].mxu1  ;;  %v948_v9 = vpop.f32.mrb[34].mxu0 }
 0x33c   :  { %v3112_v52 = vpop.f32.mrb[35].mxu1  ;;  %v3114_v7 = vpop.f32.mrb[35].mxu0 }
 0x33d   :  { %1648 = vrot.lane.b32.xlu0 %v1621_v30, %s2303_s9  ;;  %v1770_v22 = vpop.permute.xlu0 %1769 }
 0x33f   :  { %1557 = vrot.lane.b32.xlu1 %v1525_v59, %s2302_s8  ;;  %v1620_v59 = vmul.f32 %v3082_v11, %v3094_v23 }
 0x341   :  { %v3121_v13 = vpop.f32.mrb[36].mxu1  ;;  %1551 = vrot.lane.b32.xlu0 %v1522_v43, %s2302_s8  ;;  %v954_v15 = vpop.f32.mrb[36].mxu0 }
 0x342   :  { %v3124_v27 = vpop.f32.mrb[37].mxu1  ;;  %v3126_v31 = vpop.f32.mrb[37].mxu0 }
 0x343   :  { %v3129_v55 = vpop.f32.mrb[38].mxu1  ;;  %1642 = vrot.lane.b32.xlu1 %v1618_v45, %s2303_s9  ;;  %v958_v50 = vpop.f32.mrb[38].mxu0 }
 0x344   :  { %v3132_v36 = vpop.f32.mrb[39].mxu1  ;;  %v3134_v0 = vpop.f32.mrb[39].mxu0 }
 0x345   :  { %1656 = vrot.lane.b32.xlu0 %v1625_v8, %s2303_s9 }
 0x347   :  { %1545 = vrot.lane.b32.xlu1 %v1519_v2, %s2302_s8 }
 0x349   :  { %v964_v25 = vpop.f32.mrb[40].mxu0  ;;  %v3141_v33 = vpop.f32.mrb[40].mxu1  ;;  %1660 = vrot.lane.b32.xlu0 %v1627_v18, %s2303_s9 }
 0x34a   :  { %v966_v19 = vpop.f32.mrb[41].mxu0  ;;  %v3144_v54 = vpop.f32.mrb[41].mxu1 }
 0x34b   :  { %v968_v6 = vpop.f32.mrb[42].mxu0  ;;  %v3147_v10 = vpop.f32.mrb[42].mxu1  ;;  %1650 = vrot.lane.b32.xlu1 %v1622_v4, %s2303_s9 }
 0x34c   :  { %v970_v42 = vpop.f32.mrb[43].mxu0  ;;  %v3150_v35 = vpop.f32.mrb[43].mxu1 }
 0x34d   :  { %1664 = vrot.lane.b32.xlu0 %v1629_v28, %s2303_s9 }
 0x34f   :  { %1654 = vrot.lane.b32.xlu1 %v1624_v51, %s2303_s9 }
 0x351   :  { %v974_v60 = vpop.f32.mrb[44].mxu0  ;;  %1652 = vrot.lane.b32.xlu0 %v1623_v62, %s2303_s9  ;;  %v3159_v44 = vpop.f32.mrb[44].mxu1 }
 0x352   :  { %v976_v14 = vpop.f32.mrb[45].mxu0  ;;  %v3161_v30 = vpop.f32.mrb[45].mxu1 }
 0x353   :  { %v978_v9 = vpop.f32.mrb[46].mxu0  ;;  %1658 = vrot.lane.b32.xlu1 %v1626_v20, %s2303_s9  ;;  %v3164_v3 = vpop.f32.mrb[46].mxu1  ;;  %v1371_v20 = vmul.f32 %v3006_v56, %v3012_v57 }
 0x354   :  { %v980_v39 = vpop.f32.mrb[47].mxu0  ;;  %v3166_v16 = vpop.f32.mrb[47].mxu1 }
 0x355   :  { %1725 = vrot.lane.b32.xlu0 %v2193_v37, %s2294_s18  ;;  %v1772_v37 = vsel %vm1771_vm3, %v3022_v32, %v1770_v22  ;;  %v1781_v51 = vmul.f32 %v3022_v32, %v980_v39 }
 0x356   :  { %v1780_v18 = vmul.f32 %v3121_v13, %v1772_v37 }
 0x357   :  { %1646 = vrot.lane.b32.xlu1 %v1620_v59, %s2303_s9 }
 0x359   :  { %v984_v43 = vpop.f32.mrb[48].mxu0  ;;  %v3174_v45 = vpop.f32.mrb[48].mxu1  ;;  %1717 = vrot.lane.b32.xlu0 %v1141_v1, %s2294_s18 }
 0x35a   :  { %v986_v15 = vpop.f32.mrb[49].mxu0  ;;  %v3177_v8 = vpop.f32.mrb[49].mxu1 }
 0x35b   :  { %v988_v50 = vpop.f32.mrb[50].mxu0  ;;  %v3179_v2 = vpop.f32.mrb[50].mxu1  ;;  %1662 = vrot.lane.b32.xlu1 %v1628_v21, %s2303_s9  ;;  %v1852_v60 = vmul.f32 %v3034_v17, %v986_v15 }
 0x35c   :  { %v990_v11 = vpop.f32.mrb[51].mxu0  ;;  %v3182_v23 = vpop.f32.mrb[51].mxu1 }
 0x35d   :  { %1729 = vrot.lane.b32.xlu0 %v3110_v41, %s2294_s18  ;;  %v1776_v41 = vmul.f32 %v1772_v37, %v3124_v27  ;;  %v1778_v27 = vmul.f32 %v1772_v37, %v3132_v36  ;;  %v1854_v57 = vmul.f32 %v3034_v17, %v990_v11 }
 0x35f   :  { %1715 = vrot.lane.b32.xlu1 %v3106_v63, %s2294_s18  ;;  %v1782_v63 = vmul.f32 %v3129_v55, %v1772_v37  ;;  %v1377_v37 = vmul.f32 %v3006_v56, %v3024_v38 }
 0x361   :  { %v994_v53 = vpop.f32.mrb[52].mxu0  ;;  %1721 = vrot.lane.b32.xlu0 %v3112_v52, %s2294_s18  ;;  %v1775_v52 = vmul.f32 %v3022_v32, %v966_v19  ;;  %v1779_v19 = vmul.f32 %v3022_v32, %v976_v14 }
 0x362   :  { %v996_v1 = vpop.f32.mrb[53].mxu0 }
 0x363   :  { %v998_v4 = vpop.f32.mrb[54].mxu0  ;;  %1719 = vrot.lane.b32.xlu1 %v3114_v7, %s2294_s18  ;;  %v1847_v7 = vpop.permute.xlu0 %1846  ;;  %v1856_v50 = vmul.f32 %v3034_v17, %v996_v1  ;;  %v1996_v1 = vmul.f32 %v3038_v48, %v3047_v40 }
 0x364   :  { %v1000_v25 = vpop.f32.mrb[55].mxu0  ;;  %v1849_v55 = vsel %vm1848_vm4, %v3034_v17, %v1847_v7  ;;  %v1380_v4 = vmul.f32 %v3006_v56, %v3029_v46  ;;  %v1367_v46 = vsel %vm1366_vm6, %v3006_v56, %v3042_v5 }
 0x365   :  { %1801 = vrot.lane.b32.xlu0 %v1780_v18, %s2304_s20  ;;  %v1853_v36 = vmul.f32 %v1849_v55, %v3144_v54  ;;  %v1855_v9 = vmul.f32 %v1849_v55, %v3150_v35 }
 0x367   :  { %1723 = vrot.lane.b32.xlu1 %v3126_v31, %s2294_s18  ;;  %v1777_v31 = vmul.f32 %v3022_v32, %v970_v42  ;;  %v1985_v42 = vpop.permute.xlu0 %1984 }
 0x368   :  { %v1987_v38 = vsel %vm1986_vm5, %v3038_v48, %v1985_v42  ;;  %v1381_v48 = vmul.f32 %v1367_v46, %v3031_v49 }
 0x369   :  { %1793 = vrot.lane.b32.xlu0 %v1776_v41, %s2304_s20  ;;  %v1991_v7 = vmul.f32 %v1987_v38, %v3177_v8  ;;  %v1993_v49 = vmul.f32 %v1987_v38, %v3182_v23 }
 0x36b   :  { %1727 = vrot.lane.b32.xlu1 %v3134_v0, %s2294_s18  ;;  %v1857_v0 = vmul.f32 %v3141_v33, %v1849_v55  ;;  %s2305_s18 = smov 100   ;;  %v1859_v33 = vmul.f32 %v3147_v10, %v1849_v55  ;;  %v1374_v10 = vmul.f32 %v3006_v56, %v3017_v58  ;;  %v1858_v58 = vmul.f32 %v3034_v17, %v1000_v25 }
 0x36d   :  { %v3203_v13 = vpop.permute.xlu1 %1929  ;;  %1805 = vrot.lane.b32.xlu0 %v1782_v63, %s2304_s20 }
 0x36f   :  { %1791 = vrot.lane.b32.xlu1 %v1775_v52, %s2304_s20 }
 0x371   :  { %v3209_v28 = vpop.permute.xlu1 %1933  ;;  %1797 = vrot.lane.b32.xlu0 %v1778_v27, %s2304_s20 }
 0x373   :  { %1795 = vrot.lane.b32.xlu1 %v1777_v31, %s2304_s20 }
 0x375   :  { %v3216_v6 = vpop.permute.xlu1 %1937  ;;  %1878 = vrot.lane.b32.xlu0 %v1857_v0, %s2305_s18 }
 0x377   :  { %1799 = vrot.lane.b32.xlu1 %v1779_v19, %s2304_s20  ;;  %v1376_v19 = vmul.f32 %v3042_v5, %v3066_v12  ;;  %v1997_v12 = vmul.f32 %v3179_v2, %v1987_v38 }
 0x379   :  { %v3222_v62 = vpop.permute.xlu1 %1941  ;;  %1870 = vrot.lane.b32.xlu0 %v1853_v36, %s2305_s18 }
 0x37b   :  { %1803 = vrot.lane.b32.xlu1 %v1781_v51, %s2304_s20 }
 0x37d   :  { %v1420_v14 = vpop.permute.xlu1 %1419  ;;  %1882 = vrot.lane.b32.xlu0 %v1859_v33, %s2305_s18  ;;  %v3231_v54 = vpop.permute.xlu0 %1421 }
 0x37e   :  { %v1444_v32 = vsel %vm1443_vm2, %v1420_v14, %v3231_v54 }
 0x37f   :  { %v1464_v39 = vadd.f32 %v1444_v32, %v1371_v20  ;;  %1868 = vrot.lane.b32.xlu1 %v1852_v60, %s2305_s18 }
 0x381   :  { %v1428_v59 = vpop.permute.xlu1 %1427  ;;  %1874 = vrot.lane.b32.xlu0 %v1855_v9, %s2305_s18  ;;  %v1426_v21 = vpop.permute.xlu0 %1425  ;;  %v1378_v9 = vmul.f32 %v1367_v46, %v3026_v24 }
 0x382   :  { %v1446_v43 = vsel %vm1443_vm2, %v1426_v21, %v1428_v59 }
 0x383   :  { %v1467_v15 = vadd.f32 %v1446_v43, %v1374_v10  ;;  %1872 = vrot.lane.b32.xlu1 %v1854_v57, %s2305_s18  ;;  %v1372_v57 = vmul.f32 %v1367_v46, %v3014_v29 }
 0x385   :  { %v3244_v35 = vpop.permute.xlu1 %2006  ;;  %1939 = vrot.lane.b32.xlu0 %v3159_v44, %s2300_s3  ;;  %v1434_v22 = vpop.permute.xlu0 %1433 }
 0x387   :  { %1876 = vrot.lane.b32.xlu1 %v1856_v50, %s2305_s18 }
 0x389   :  { %v3250_v11 = vpop.permute.xlu1 %2010  ;;  %1931 = vrot.lane.b32.xlu0 %v3161_v30, %s2300_s3  ;;  %v1438_v53 = vpop.permute.xlu0 %1437 }
 0x38b   :  { %1880 = vrot.lane.b32.xlu1 %v1858_v58, %s2305_s18 }
 0x38d   :  { %v1432_v44 = vpop.permute.xlu1 %1431  ;;  %1943 = vrot.lane.b32.xlu0 %v3164_v3, %s2300_s3  ;;  %v1995_v3 = vmul.f32 %v3174_v45, %v1987_v38 }
 0x38e   :  { %v1448_v17 = vsel %vm1443_vm2, %v1432_v44, %v1434_v22 }
 0x38f   :  { %v1470_v18 = vadd.f32 %v1448_v17, %v1377_v37  ;;  %2018 = vrot.lane.b32.xlu1 %v1996_v1, %s2301_s7  ;;  %v3263_v30 = vpop.permute.xlu0 %1543 }
 0x391   :  { %v1440_v25 = vpop.permute.xlu1 %1439  ;;  %1935 = vrot.lane.b32.xlu0 %v3166_v16, %s2300_s3  ;;  %v1382_v16 = vmul.f32 %v3063_v34, %v3042_v5  ;;  %v1375_v34 = vmul.f32 %v1367_v46, %v3019_v26 }
 0x392   :  { %v1450_v40 = vsel %vm1443_vm2, %v1438_v53, %v1440_v25 }
 0x393   :  { %v1473_v41 = vadd.f32 %v1450_v40, %v1380_v4  ;;  %v1548_v63 = vpop.permute.xlu0 %1547 }
 0x395   :  { %v3273_v52 = vpop.permute.xlu1 %2014  ;;  %2016 = vrot.lane.b32.xlu0 %v1995_v3, %s2301_s7 }
 0x397   :  { %v1442_v27 = vpop.permute.xlu0 %1441 }
 0x398   :  { %v1451_v45 = vsel %vm1443_vm2, %v1440_v25, %v1442_v27  ;;  %v1475_v31 = vadd.f32 %v1442_v27, %v1382_v16 }
 0x399   :  { %v1474_v55 = vadd.f32 %v1451_v45, %v1381_v48  ;;  %v1542_v0 = vpop.permute.xlu1 %1541  ;;  %2008 = vrot.lane.b32.xlu0 %v1991_v7, %s2301_s7 }
 0x39a   :  { %v1566_v56 = vsel %vm1565_vm7, %v1542_v0, %v3263_v30 }
 0x39b   :  { %v1586_v8 = vadd.f32 %v1566_v56, %v1464_v39  ;;  %v1430_v36 = vpop.permute.xlu0 %1429 }
 0x39c   :  { %v1447_v42 = vsel %vm1443_vm2, %v1428_v59, %v1430_v36  ;;  %v1469_v51 = vadd.f32 %v1430_v36, %v1376_v19 }
 0x39d   :  { %v1468_v33 = vadd.f32 %v1447_v42, %v1375_v34  ;;  %v1550_v20 = vpop.permute.xlu1 %1549  ;;  %2012 = vrot.lane.b32.xlu0 %v1993_v49, %s2301_s7 }
 0x39e   :  { %v1568_v60 = vsel %vm1565_vm7, %v1548_v63, %v1550_v20 }
 0x39f   :  { %v1589_v14 = vadd.f32 %v1568_v60, %v1467_v15  ;;  %v1556_v32 = vpop.permute.xlu0 %1555 }
 0x3a1   :  { %v3296_v26 = vpop.permute.xlu1 %1435  ;;  %2020 = vrot.lane.b32.xlu0 %v1997_v12, %s2301_s7 }
 0x3a2   :  { %v1449_v23 = vsel %vm1443_vm2, %v1434_v22, %v3296_v26 }
 0x3a3   :  { %v1471_v39 = vadd.f32 %v1449_v23, %v1378_v9  ;;  %v1560_v10 = vpop.permute.xlu0 %1559 }
 0x3a5   :  { %v3302_v59 = vpop.permute.xlu1 %1423 }
 0x3a6   :  { %v1445_v2 = vsel %vm1443_vm2, %v3231_v54, %v3302_v59 }
 0x3a7   :  { %v1465_v21 = vadd.f32 %v1445_v2, %v1372_v57  ;;  %v1645_v43 = vpop.permute.xlu0 %1644 }
 0x3a9   :  { %v1554_v24 = vpop.permute.xlu1 %1553 }
 0x3aa   :  { %v1570_v15 = vsel %vm1565_vm7, %v1554_v24, %v1556_v32 }
 0x3ab   :  { %v1592_v50 = vadd.f32 %v1570_v15, %v1470_v18  ;;  %v1564_v58 = vpop.permute.xlu0 %1563 }
 0x3ac   :  { %v1597_v53 = vadd.f32 %v1564_v58, %v1475_v31 }
 0x3ad   :  { %v1562_v37 = vpop.permute.xlu1 %1561 }
 0x3ae   :  { %v1572_v22 = vsel %vm1565_vm7, %v1560_v10, %v1562_v37  ;;  %v1573_v1 = vsel %vm1565_vm7, %v1562_v37, %v1564_v58 }
 0x3af   :  { %v1595_v29 = vadd.f32 %v1572_v22, %v1473_v41  ;;  %v1596_v44 = vadd.f32 %v1573_v1, %v1474_v55  ;;  %v1649_v17 = vpop.permute.xlu0 %1648 }
 0x3b1   :  { %v3310_v4 = vpop.permute.xlu1 %1557 }
 0x3b2   :  { %v1571_v54 = vsel %vm1565_vm7, %v1556_v32, %v3310_v4 }
 0x3b3   :  { %v1593_v25 = vadd.f32 %v1571_v54, %v1471_v39  ;;  %v1552_v38 = vpop.permute.xlu0 %1551 }
 0x3b4   :  { %v1569_v18 = vsel %vm1565_vm7, %v1550_v20, %v1552_v38  ;;  %v1591_v40 = vadd.f32 %v1552_v38, %v1469_v51 }
 0x3b5   :  { %v1590_v3 = vadd.f32 %v1569_v18, %v1468_v33  ;;  %v1643_v63 = vpop.permute.xlu1 %1642 }
 0x3b6   :  { %v1667_v46 = vsel %vm1666_vm8, %v1643_v63, %v1645_v43 }
 0x3b7   :  { %v3316_v16 = vadd.f32 %v1667_v46, %v1586_v8  ;;  %v1657_v41 = vpop.permute.xlu0 %1656 }
 0x3b9   :  { %v1546_v48 = vpop.permute.xlu1 %1545 }
 0x3ba   :  { %v1567_v7 = vsel %vm1565_vm7, %v3263_v30, %v1546_v48 }
 0x3bb   :  { %v1587_v27 = vadd.f32 %v1567_v7, %v1465_v21  ;;  %v1661_v45 = vpop.permute.xlu0 %1660 }
 0x3bd   :  { %v1651_v31 = vpop.permute.xlu1 %1650 }
 0x3be   :  { %v1669_v55 = vsel %vm1666_vm8, %v1649_v17, %v1651_v31 }
 0x3bf   :  { %v3321_v0 = vadd.f32 %v1669_v55, %v1589_v14  ;;  %v1665_v19 = vpop.permute.xlu0 %1664 }
 0x3c0   :  { %v1698_v56 = vadd.f32 %v1665_v19, %v1597_v53 }
 0x3c1   :  { %v1655_v34 = vpop.permute.xlu1 %1654 }
 0x3c2   :  { %v1671_v49 = vsel %vm1666_vm8, %v1655_v34, %v1657_v41 }
 0x3c3   :  { %v3324_v36 = vadd.f32 %v1671_v49, %v1592_v50  ;;  %v1653_v8 = vpop.permute.xlu0 %1652 }
 0x3c4   :  { %v1670_v42 = vsel %vm1666_vm8, %v1651_v31, %v1653_v8  ;;  %v3327_v51 = vadd.f32 %v1653_v8, %v1591_v40 }
 0x3c5   :  { %v3329_v30 = vadd.f32 %v1670_v42, %v1590_v3  ;;  %v1659_v33 = vpop.permute.xlu1 %1658 }
 0x3c6   :  { %v1672_v20 = vsel %vm1666_vm8, %v1657_v41, %v1659_v33 }
 0x3c7   :  { %v1694_v60 = vadd.f32 %v1672_v20, %v1593_v25  ;;  %v1726_v12 = vpop.permute.xlu0 %1725 }
 0x3c9   :  { %v1647_v14 = vpop.permute.xlu1 %1646 }
 0x3ca   :  { %v1668_v32 = vsel %vm1666_vm8, %v1645_v43, %v1647_v14 }
 0x3cb   :  { %v3333_v9 = vadd.f32 %v1668_v32, %v1587_v27  ;;  %v1718_v23 = vpop.permute.xlu0 %1717  ;;  %v1379_v27 = vmul.f32 %v3058_v61, %v3042_v5 }
 0x3cd   :  { %v1663_v39 = vpop.permute.xlu1 %1662  ;;  %v1472_v31 = vadd.f32 %v3296_v26, %v1379_v27 }
 0x3ce   :  { %v1673_v10 = vsel %vm1666_vm8, %v1661_v45, %v1663_v39  ;;  %v1674_v57 = vsel %vm1666_vm8, %v1663_v39, %v1665_v19  ;;  %v1373_v19 = vmul.f32 %v3042_v5, %v3060_v47 }
 0x3cf   :  { %v3337_v2 = vadd.f32 %v1673_v10, %v1595_v29  ;;  %v1697_v21 = vadd.f32 %v1674_v57, %v1596_v44  ;;  %v1730_v24 = vpop.permute.xlu0 %1729 }
 0x3d0   :  { %v3339_v15 = vadd.f32 %v1730_v24, %v1698_v56  ;;  %v1594_v56 = vadd.f32 %v3310_v4, %v1472_v31  ;;  %v1466_v49 = vadd.f32 %v3302_v59, %v1373_v19 }
 0x3d1   :  { %v1716_v50 = vpop.permute.xlu1 %1715 }
 0x3d2   :  { %v1695_v8 = vadd.f32 %v1659_v33, %v1594_v56  ;;  %v1588_v42 = vadd.f32 %v1546_v48, %v1466_v49  ;;  %v1747_v26 = vadd.f32 %v1716_v50, %v3316_v16  ;;  %v1731_v48 = vsel %vm1366_vm6, %v1716_v50, %v1718_v23 }
 0x3d3   :  { %v1722_v58 = vpop.permute.xlu0 %1721  ;;  %v1748_v19 = vadd.f32 %v1731_v48, %v3333_v9 }
 0x3d4   :  { %v1755_v61 = vadd.f32 %v1726_v12, %v1695_v8  ;;  %v1689_v32 = vadd.f32 %v1647_v14, %v1588_v42 }
 0x3d5   :  { %v1720_v53 = vpop.permute.xlu1 %1719 }
 0x3d6   :  { %v1749_v57 = vadd.f32 %v1718_v23, %v1689_v32  ;;  %v1732_v14 = vsel %vm1366_vm6, %v1720_v53, %v1722_v58 }
 0x3d7   :  { %v3341_v37 = vpop.permute.xlu0 %1801 }
 0x3d8   :  { %v1832_v39 = vadd.f32 %v3341_v37, %v1755_v61 }
 0x3d9   :  { %v1724_v43 = vpop.permute.xlu1 %1723 }
 0x3da   :  { %v1733_v22 = vsel %vm1366_vm6, %v1724_v43, %v1726_v12  ;;  %v1752_v12 = vadd.f32 %v1722_v58, %v3327_v51  ;;  %v1750_v51 = vadd.f32 %v1720_v53, %v3321_v0  ;;  %v1751_v58 = vadd.f32 %v1732_v14, %v3329_v30 }
 0x3db   :  { %v3344_v1 = vadd.f32 %v1733_v22, %v1694_v60  ;;  %v1794_v17 = vpop.permute.xlu0 %1793  ;;  %v1753_v8 = vadd.f32 %v1724_v43, %v3324_v36 }
 0x3dd   :  { %v3346_v54 = vpop.permute.xlu1 %1727 }
 0x3de   :  { %v1734_v29 = vsel %vm1366_vm6, %v3346_v54, %v1730_v24 }
 0x3df   :  { %v3350_v44 = vadd.f32 %v1734_v29, %v1697_v21  ;;  %v3352_v25 = vpop.permute.xlu0 %1805  ;;  %v1826_v21 = vadd.f32 %v1794_v17, %v1749_v57 }
 0x3e1   :  { %v1792_v18 = vpop.permute.xlu1 %1791 }
 0x3e2   :  { %v1824_v4 = vadd.f32 %v1792_v18, %v1747_v26  ;;  %v1808_v29 = vsel %vm1807_vm9, %v1792_v18, %v1794_v17 }
 0x3e3   :  { %v1798_v38 = vpop.permute.xlu0 %1797 }
 0x3e4   :  { %v1829_v27 = vadd.f32 %v1798_v38, %v1752_v12 }
 0x3e5   :  { %v1796_v63 = vpop.permute.xlu1 %1795 }
 0x3e6   :  { %v1809_v31 = vsel %vm1807_vm9, %v1796_v63, %v1798_v38  ;;  %v1825_v38 = vadd.f32 %v1808_v29, %v1748_v19  ;;  %v1827_v61 = vadd.f32 %v1796_v63, %v1750_v51 }
 0x3e7   :  { %v3354_v40 = vpop.permute.xlu0 %1878  ;;  %v1828_v32 = vadd.f32 %v1809_v31, %v1751_v58  ;;  %v1835_v58 = vadd.f32 %v3352_v25, %v3339_v15 }
 0x3e8   :  { %v1909_v5 = vadd.f32 %v3354_v40, %v1832_v39 }
 0x3e9   :  { %v1800_v41 = vpop.permute.xlu1 %1799 }
 0x3ea   :  { %v1810_v9 = vsel %vm1807_vm9, %v1800_v41, %v3341_v37  ;;  %v1830_v0 = vadd.f32 %v1800_v41, %v1753_v8 }
 0x3eb   :  { %v1871_v3 = vpop.permute.xlu0 %1870 }
 0x3ec   :  { %v1903_v16 = vadd.f32 %v1871_v3, %v1826_v21  ;;  %v1756_v21 = vadd.f32 %v3346_v54, %v3337_v2 }
 0x3ed   :  { %v3363_v55 = vpop.permute.xlu1 %1803 }
 0x3ee   :  { %v1811_v30 = vsel %vm1807_vm9, %v3363_v55, %v3352_v25  ;;  %v1833_v12 = vadd.f32 %v3363_v55, %v1756_v21 }
 0x3ef   :  { %v3356_v46 = vpop.permute.xlu0 %1882 }
 0x3f1   :  { %v1869_v20 = vpop.permute.xlu1 %1868 }
 0x3f2   :  { %v1901_v33 = vadd.f32 %v1869_v20, %v1824_v4  ;;  %v1885_v17 = vsel %vm1884_vm10, %v1869_v20, %v1871_v3 }
 0x3f3   :  { %v1875_v7 = vpop.permute.xlu0 %1874  ;;  %v1902_v36 = vadd.f32 %v1885_v17, %v1825_v38 }
 0x3f4   :  { %v1962_v56 = vadd.f32 %v3203_v13, %v1901_v33  ;;  %v1906_v18 = vadd.f32 %v1875_v7, %v1829_v27 }
 0x3f5   :  { %v1873_v47 = vpop.permute.xlu1 %1872 }
 0x3f6   :  { %v1886_v39 = vsel %vm1884_vm10, %v1873_v47, %v1875_v7  ;;  %v2039_v43 = vadd.f32 %v3244_v35, %v1962_v56  ;;  %v1904_v20 = vadd.f32 %v1873_v47, %v1827_v61 }
 0x3f7   :  { %v3360_v45 = vpop.permute.xlu0 %1939  ;;  %v1905_v37 = vadd.f32 %v1886_v39, %v1828_v32 }
 0x3f8   :  { %v1970_v59 = vadd.f32 %v3360_v45, %v1909_v5  ;;  %v1965_v48 = vadd.f32 %v3209_v28, %v1904_v20  ;;  %v1948_v55 = vsel %vm1945_vm11, %v3216_v6, %v3360_v45 }
 0x3f9   :  { %v1877_v23 = vpop.permute.xlu1 %1876 }
 0x3fa   :  { %v1907_v41 = vadd.f32 %v1877_v23, %v1830_v0  ;;  %v1887_v47 = vsel %vm1884_vm10, %v1877_v23, %v3354_v40 }
 0x3fb   :  { %v1932_v34 = vpop.permute.xlu0 %1931 }
 0x3fc   :  { %v1964_v50 = vadd.f32 %v1932_v34, %v1903_v16  ;;  %v1946_v3 = vsel %vm1945_vm11, %v3203_v13, %v1932_v34  ;;  %v1831_v34 = vadd.f32 %v1810_v9, %v3344_v1  ;;  %v1968_v2 = vadd.f32 %v3216_v6, %v1907_v41 }
 0x3fd   :  { %v1881_v26 = vpop.permute.xlu1 %1880  ;;  %v1912_v6 = vadd.f32 %v3356_v46, %v1835_v58 }
 0x3fe   :  { %v1908_v14 = vadd.f32 %v1887_v47, %v1831_v34  ;;  %v1910_v40 = vadd.f32 %v1881_v26, %v1833_v12 }
 0x3ff   :  { %v3369_v60 = vpop.permute.xlu0 %1943 }
 0x400   :  { %v1949_v1 = vsel %vm1945_vm11, %v3222_v62, %v3369_v60  ;;  %v1973_v45 = vadd.f32 %v3369_v60, %v1912_v6 }
 0x401   :  { %v2019_v29 = vpop.permute.xlu1 %2018 }
 0x403   :  { %v1936_v10 = vpop.permute.xlu0 %1935 }
 0x404   :  { %v1967_v53 = vadd.f32 %v1936_v10, %v1906_v18  ;;  %v1947_v63 = vsel %vm1945_vm11, %v3209_v28, %v1936_v10  ;;  %v1834_v10 = vadd.f32 %v1811_v30, %v3350_v44  ;;  %v2042_v44 = vadd.f32 %v3250_v11, %v1965_v48 }
 0x405   :  { %v1966_v13 = vadd.f32 %v1947_v63, %v1905_v37  ;;  %v2045_v28 = vadd.f32 %v3273_v52, %v1968_v2 }
 0x407   :  { %v3376_v24 = vpop.permute.xlu0 %2016 }
 0x408   :  { %v2047_v22 = vadd.f32 %v3376_v24, %v1970_v59  ;;  %v1963_v59 = vadd.f32 %v1946_v3, %v1902_v36  ;;  %v2025_v27 = vsel %vm2022_vm12, %v3273_v52, %v3376_v24 }
 0x40a   :  { %2079 = vrot.lane.b32.xlu1 %v2047_v22, %s2299_s22 }
 0x40b   :  { %v2009_v49 = vpop.permute.xlu0 %2008 }
 0x40c   :  { %v2041_v42 = vadd.f32 %v2009_v49, %v1964_v50  ;;  %v2023_v5 = vsel %vm2022_vm12, %v3244_v35, %v2009_v49  ;;  %v1888_v35 = vsel %vm1884_vm10, %v1881_v26, %v3356_v46  ;;  %v1969_v50 = vadd.f32 %v1948_v55, %v1908_v14 }
 0x40d   :  { %v2040_v54 = vadd.f32 %v2023_v5, %v1963_v59  ;;  %v1911_v16 = vadd.f32 %v1888_v35, %v1834_v10 }
 0x40e   :  { %2067 = vrot.lane.b32.xlu1 %v2041_v42, %s2299_s22  ;;  %v2046_v19 = vadd.f32 %v2025_v27, %v1969_v50 }
 0x40f   :  { %v2013_v7 = vpop.permute.xlu0 %2012  ;;  %v1972_v23 = vadd.f32 %v1949_v1, %v1911_v16 }
 0x410   :  { %v2044_v57 = vadd.f32 %v2013_v7, %v1967_v53  ;;  %v2024_v4 = vsel %vm2022_vm12, %v3250_v11, %v2013_v7  ;;  %v1971_v11 = vadd.f32 %v3222_v62, %v1910_v40 }
 0x411   :  { %v2043_v33 = vadd.f32 %v2024_v4, %v1966_v13 }
 0x412   :  { %2063 = vrot.lane.b32.xlu1 %v2039_v43, %s2299_s22  ;;  %2073 = vrot.lane.b32.xlu0 %v2044_v57, %s2299_s22  ;;  %v2048_v52 = vadd.f32 %v2019_v29, %v1971_v11 }
 0x413   :  { %v2021_v22 = vpop.permute.xlu0 %2020 }
 0x414   :  { %v2026_v31 = vsel %vm2022_vm12, %v2019_v29, %v2021_v22  ;;  %v2050_v24 = vadd.f32 %v2021_v22, %v1973_v45 }
 0x415   :  { %v2049_v51 = vadd.f32 %v2026_v31, %v1972_v23 }
 0x416   :  { %2065 = vrot.lane.b32.xlu0 %v2040_v54, %s2299_s22  ;;  %2071 = vrot.lane.b32.xlu1 %v2043_v33, %s2299_s22 }
 0x41a   :  { %2069 = vrot.lane.b32.xlu0 %v2042_v44, %s2299_s22  ;;  %2075 = vrot.lane.b32.xlu1 %v2045_v28, %s2299_s22 }
 0x41e   :  { %2077 = vrot.lane.b32.xlu0 %v2046_v19, %s2299_s22  ;;  %2083 = vrot.lane.b32.xlu1 %v2049_v51, %s2299_s22 }
 0x422   :  { %2081 = vrot.lane.b32.xlu0 %v2048_v52, %s2299_s22 }
 0x426   :  { %2085 = vrot.lane.b32.xlu0 %v2050_v24, %s2299_s22 }
 0x47c   :  { %v2080_v62 = vpop.permute.xlu1 %2079 }
 0x480   :  { %v2068_v56 = vpop.permute.xlu1 %2067 }
 0x484   :  { %v2064_v49 = vpop.permute.xlu1 %2063  ;;  %v2074_v8 = vpop.permute.xlu0 %2073 }
 0x488   :  { %v2072_v17 = vpop.permute.xlu1 %2071  ;;  %v2066_v15 = vpop.permute.xlu0 %2065 }
 0x489   :  { %v2090_v25 = vsel %vm1986_vm5, %v2072_v17, %v2074_v8  ;;  %v2087_v18 = vsel %vm1986_vm5, %v2064_v49, %v2066_v15  ;;  %v2088_v46 = vsel %vm1986_vm5, %v2066_v15, %v2068_v56 }
 0x48a   :  { %2106 = vst.msk [vmem:[%s3485_s5 + $0x18] sm:$0xff] %vm53_vm0, %v2090_v25  ;;  %2103 = vst [vmem:[%s3485_s5] sm:$0xff] %v2087_v18 }
 0x48b   :  { %2104 = vst.msk [vmem:[%s3485_s5 + $0x8] sm:$0xff] %vm53_vm0, %v2088_v46 }
 0x48c   :  { %v2070_v60 = vpop.permute.xlu0 %2069  ;;  %v2076_v38 = vpop.permute.xlu1 %2075 }
 0x48d   :  { %v2089_v42 = vsel %vm1986_vm5, %v2070_v60, %v2072_v17 }
 0x48e   :  { %2105 = vst [vmem:[%s3485_s5 + $0x10] sm:$0xff] %v2089_v42 }
 0x490   :  { %v2078_v61 = vpop.permute.xlu0 %2077  ;;  %v2084_v9 = vpop.permute.xlu1 %2083 }
 0x491   :  { %v2091_v32 = vsel %vm1986_vm5, %v2076_v38, %v2078_v61  ;;  %v2092_v39 = vsel %vm1986_vm5, %v2078_v61, %v2080_v62 }
 0x492   :  { %2107 = vst [vmem:[%s3485_s5 + $0x20] sm:$0xff] %v2091_v32  ;;  %2108 = vst.msk [vmem:[%s3485_s5 + $0x28] sm:$0xff] %vm53_vm0, %v2092_v39 }
 0x494   :  { %v2082_v0 = vpop.permute.xlu0 %2081 }
 0x495   :  { %v2093_v30 = vsel %vm1986_vm5, %v2082_v0, %v2084_v9 }
 0x496   :  { %2109 = vst [vmem:[%s3485_s5 + $0x30] sm:$0xff] %v2093_v30 }
 0x498   :  { %v2086_v53 = vpop.permute.xlu0 %2085 }
 0x499   :  { %v2094_v36 = vsel %vm1986_vm5, %v2084_v9, %v2086_v53 }
 0x49a   :  { %2110 = vst.msk [vmem:[%s3485_s5 + $0x38] sm:$0xff] %vm53_vm0, %v2094_v36 }

</bundles_post_ra>
